<compile_context>
chip_gen: v5e
topology: v5e:2x2
jax: 0.10.0
libtpu: 0.0.40
codegen_flags: <defaults>
</compile_context>

<pallas_src>
import jax
import jax.numpy as jnp
from jax.experimental import pallas as pl
from jax.experimental.pallas import tpu as pltpu

NUM_CLASSES = 8
OVERLAP_THRESH = 0.5
NEGPOS_RATIO = 3
VARIANCE = (0.1, 0.2)

NUM_PRIORS = 32                          # P
LOC_DIM = 4 * NUM_PRIORS                 # 128  (flattened loc slab width)
CONF_DIM = NUM_CLASSES * NUM_PRIORS      # 256  (class-major conf slab width)
HEAD_OUT = LOC_DIM + CONF_DIM            # 384
OUT_LANES = 128                          # lane-dense reduced-output width
TM_MAX = 128                             # batch tile height (<=128: v5e MXU safe)
SUBLANE = 8                              # f32 sublane quantum (epilogue is f32)


def _round_up(x, m):
    return (x + m - 1) // m * m


# ----------------------------------------------------------------------------
# Fused kernel: head matmul (MXU, bf16 in / f32 acc) + per-prior CE +
# masked Smooth-L1 + rank-by-count hard-negative mining.
# One grid step per TM-row batch tile ("parallel" across TCs when >1 step).
# ----------------------------------------------------------------------------
def _fused_head_loss_kernel(x_ref, w_ref, b_ref, conf_t_ref, pos4_ref,
                            loct_ref, out_ref):
    tm = out_ref.shape[0]

    # ---- synthetic SSD head: one MXU pass over the whole batch tile ----
    out = jnp.dot(x_ref[...], w_ref[...],
                  preferred_element_type=jnp.float32)          # (TM, O) f32
    out = out + b_ref[...]                                     # bias epilogue

    # ---- localization: masked Smooth-L1 (beta = 1.0), reduced per row ----
    diff = out[:, :LOC_DIM] - loct_ref[...]                    # (TM, 128)
    ad = jnp.abs(diff)
    sl1 = jnp.where(ad < 1.0, 0.5 * diff * diff, ad - 0.5)
    loss_l_row = jnp.sum(sl1 * pos4_ref[...], axis=-1, keepdims=True)  # (TM,1)

    # ---- confidence: per-prior CE = log_sum_exp - target logit ----
    tgt = conf_t_ref[...]                                      # (TM, P) int32
    logits = [out[:, LOC_DIM + c * NUM_PRIORS: LOC_DIM + (c + 1) * NUM_PRIORS]
              for c in range(NUM_CLASSES)]                     # 8 x (TM, P)
    m = logits[0]
    for c in range(1, NUM_CLASSES):
        m = jnp.maximum(m, logits[c])                          # per-prior max
    s = jnp.zeros_like(m)
    g = jnp.zeros_like(m)
    for c in range(NUM_CLASSES):
        s = s + jnp.exp(logits[c] - m)
        g = g + jnp.where(tgt == c, logits[c], 0.0)            # one-hot gather
    ce = jnp.log(s) + m - g                                    # (TM, P)

    # ---- fused hard-negative mining (rank-by-count, no sort) ----
    pos = jnp.where(tgt > 0, 1.0, 0.0)                         # (TM, P)
    mine = ce * (1.0 - pos)                                    # zero positives
    rank = jnp.zeros_like(mine)
    for j in range(NUM_PRIORS):                                # unrolled VPU
        rank = rank + jnp.where(mine[:, j:j + 1] > mine, 1.0, 0.0)
    num_pos_row = jnp.sum(pos, axis=-1, keepdims=True)         # (TM, 1)
    num_neg_row = jnp.minimum(NEGPOS_RATIO * num_pos_row,
                              float(NUM_PRIORS - 1))
    sel = jnp.where(jnp.logical_or(pos > 0.0, rank < num_neg_row), 1.0, 0.0)
    loss_c_row = jnp.sum(ce * sel, axis=-1, keepdims=True)     # (TM, 1)

    # ---- single lane-dense output: lane0 = loss_l, lane1 = loss_c ----
    lane = jax.lax.broadcasted_iota(jnp.int32, (tm, OUT_LANES), 1)
    out_ref[...] = jnp.where(lane == 0, loss_l_row,
                             jnp.where(lane == 1, loss_c_row, 0.0))


def fused_head_and_losses(x, w, bias, conf_t, pos4, loc_t_flat, tm):
    Bp, D = x.shape
    O = w.shape[1]
    P = conf_t.shape[1]
    grid = (Bp // tm,)
    cost = pl.CostEstimate(
        flops=2 * Bp * D * O + 64 * Bp * P * NUM_CLASSES,
        transcendentals=Bp * P * (NUM_CLASSES + 1),
        bytes_accessed=(2 * (x.size + w.size)
                        + 4 * (bias.size + conf_t.size + pos4.size
                               + loc_t_flat.size + Bp * OUT_LANES)),
    )
    return pl.pallas_call(
        _fused_head_loss_kernel,
        out_shape=jax.ShapeDtypeStruct((Bp, OUT_LANES), jnp.float32),
        grid=grid,
        in_specs=[
            pl.BlockSpec((tm, D), lambda i: (i, 0)),        # x  (bf16)
            pl.BlockSpec((D, O), lambda i: (0, 0)),         # W  (bf16, resident)
            pl.BlockSpec((1, O), lambda i: (0, 0)),         # bias (f32)
            pl.BlockSpec((tm, P), lambda i: (i, 0)),        # conf_t (int32)
            pl.BlockSpec((tm, 4 * P), lambda i: (i, 0)),    # pos mask (4x)
            pl.BlockSpec((tm, 4 * P), lambda i: (i, 0)),    # loc targets
        ],
        out_specs=pl.BlockSpec((tm, OUT_LANES), lambda i: (i, 0)),
        compiler_params=pltpu.CompilerParams(
            dimension_semantics=("parallel",)),
        cost_estimate=cost,
    )(x, w, bias, conf_t, pos4, loc_t_flat)


# ----------------------------------------------------------------------------
# Box utilities (plain JAX glue): jaccard matching + offset encoding
# (prediction-independent, scatter/argmax-heavy — kept outside the kernel)
# ----------------------------------------------------------------------------
def point_form(priors):  # (cx, cy, w, h) -> (x1, y1, x2, y2)
    return jnp.concatenate(
        [priors[:, :2] - priors[:, 2:] / 2.0,
         priors[:, :2] + priors[:, 2:] / 2.0], axis=1)


def jaccard(box_a, box_b):  # [A,4], [B,4] in point form
    max_xy = jnp.minimum(box_a[:, None, 2:], box_b[None, :, 2:])
    min_xy = jnp.maximum(box_a[:, None, :2], box_b[None, :, :2])
    wh = jnp.maximum(max_xy - min_xy, 0.0)
    inter = wh[..., 0] * wh[..., 1]
    area_a = ((box_a[:, 2] - box_a[:, 0]) * (box_a[:, 3] - box_a[:, 1]))[:, None]
    area_b = ((box_b[:, 2] - box_b[:, 0]) * (box_b[:, 3] - box_b[:, 1]))[None, :]
    return inter / (area_a + area_b - inter)


def encode(matched, priors, variances):
    g_cxcy = (matched[:, :2] + matched[:, 2:]) / 2.0 - priors[:, :2]
    g_cxcy = g_cxcy / (variances[0] * priors[:, 2:])
    g_wh = (matched[:, 2:] - matched[:, :2]) / priors[:, 2:]
    g_wh = jnp.log(jnp.maximum(g_wh, 1e-10)) / variances[1]   # guard log(0)
    return jnp.concatenate([g_cxcy, g_wh], axis=1)


def match_one(threshold, truths, priors, variances, labels):
    overlaps = jaccard(truths, point_form(priors))           # [n_obj, P]
    best_prior_idx = jnp.argmax(overlaps, axis=1)            # [n_obj]
    best_truth_overlap = jnp.max(overlaps, axis=0)           # [P]
    best_truth_idx = jnp.argmax(overlaps, axis=0)            # [P]
    best_truth_overlap = best_truth_overlap.at[best_prior_idx].set(2.0)
    n_obj = truths.shape[0]

    def body(j, bti):   # sequential override, mirrors the torch loop
        return bti.at[best_prior_idx[j]].set(j)
    best_truth_idx = jax.lax.fori_loop(0, n_obj, body, best_truth_idx)

    matches = truths[best_truth_idx]                         # [P, 4]
    conf = labels[best_truth_idx].astype(jnp.int32) + 1      # [P]
    conf = jnp.where(best_truth_overlap < threshold, 0, conf)
    loc = encode(matches, priors, variances)
    return loc, conf


def make_priors():
    f = 4
    xs = (jnp.arange(f, dtype=jnp.float32) + 0.5) / f
    cy, cx = jnp.meshgrid(xs, xs, indexing="ij")
    centers = jnp.stack([cx.ravel(), cy.ravel()], axis=1)    # [16, 2]
    p1 = jnp.concatenate([centers, jnp.full((f * f, 2), 0.2, jnp.float32)], axis=1)
    p2 = jnp.concatenate([centers, jnp.full((f * f, 2), 0.35, jnp.float32)], axis=1)
    return jnp.concatenate([p1, p2], axis=0)                 # [32, 4] cx,cy,w,h


# ----------------------------------------------------------------------------
# NetwithLoss.forward (teacher-only path)
#   w is expected pre-cast to bf16 (done once outside the jitted call).
# ----------------------------------------------------------------------------
def netwithloss_forward(images, targets, w, b, priors):
    B = images.shape[0]
    P = priors.shape[0]

    # ----- match GT boxes to priors (prediction-independent, vmapped) -----
    def match_fn(t):
        return match_one(OVERLAP_THRESH, t[:, :-1], priors, VARIANCE, t[:, -1])
    loc_t, conf_t = jax.vmap(match_fn)(targets)              # [B,P,4], [B,P]
    conf_t = jnp.clip(conf_t.astype(jnp.int32), 0, NUM_CLASSES - 1)

    pos = conf_t > 0
    pos_f = pos.astype(jnp.float32)
    pos4 = jnp.repeat(pos_f, 4, axis=1)                      # [B, 4P] prior-major
    loc_t_flat = loc_t.reshape(B, P * 4)                     # prior-major
    x = images.reshape(B, -1).astype(jnp.bfloat16)

    # ----- fold batch into the matmul M dimension (pad to sublane/tile) -----
    B_pad = _round_up(B, SUBLANE)
    tm = min(B_pad, TM_MAX)
    B_pad = _round_up(B_pad, tm)
    pad = B_pad - B
    if pad:                                                  # static Python
        x = jnp.pad(x, ((0, pad), (0, 0)))
        conf_t = jnp.pad(conf_t, ((0, pad), (0, 0)))         # background rows
        pos4 = jnp.pad(pos4, ((0, pad), (0, 0)))             # -> contribute 0
        loc_t_flat = jnp.pad(loc_t_flat, ((0, pad), (0, 0)))

    # ----- fused head + CE + Smooth-L1 + hard-negative mining -----
    reduced = fused_head_and_losses(x, w.astype(jnp.bfloat16), b,
                                    conf_t, pos4, loc_t_flat, tm)
    loss_l = jnp.sum(reduced[:, 0])                          # Smooth-L1 sum
    loss_c = jnp.sum(reduced[:, 1])                          # mined CE sum

    N = jnp.maximum(jnp.sum(pos_f), 1.0)                     # guard /0
    loss = (loss_c + loss_l) / N
    return loss, loss


if __name__ == "__main__":
    key = jax.random.PRNGKey(0)
    B, C, H, W = 2, 4, 16, 16        # images
    n_obj = 3                        # GT boxes per image
    P = NUM_PRIORS                   # 32 priors
    D = C * H * W                    # 1024
    O = HEAD_OUT                     # 384
    assert P * 4 + P * NUM_CLASSES == O

    k_img, k_w, k_b, k_ctr, k_wh, k_lab = jax.random.split(key, 6)
    images = jax.random.normal(k_img, (B, C, H, W), jnp.float32)

    # deterministic synthetic teacher-head parameters, stored in bf16 once
    # (avoids a per-forward f32->bf16 cast / HBM round-trip of the weight)
    w = jax.random.normal(k_w, (D, O), jnp.float32) * 0.05
    w_bf16 = w.astype(jnp.bfloat16)
    b = jax.random.normal(k_b, (1, O), jnp.float32) * 0.01

    # deterministic targets: [B, n_obj, 5] = (x1, y1, x2, y2, label)
    ctr = jax.random.uniform(k_ctr, (B, n_obj, 2), minval=0.25, maxval=0.75)
    wh = jax.random.uniform(k_wh, (B, n_obj, 2), minval=0.10, maxval=0.30)
    boxes = jnp.concatenate([ctr - wh / 2.0, ctr + wh / 2.0], axis=-1)
    labels = jax.random.randint(k_lab, (B, n_obj, 1), 0, NUM_CLASSES - 1)
    targets = jnp.concatenate([boxes, labels.astype(jnp.float32)], axis=-1)

    priors = make_priors()

    fwd = jax.jit(netwithloss_forward)
    loss, loss_dup = fwd(images, targets, w_bf16, b, priors)
    jax.block_until_ready(loss)
    assert bool(jnp.isfinite(loss)), "loss is not finite"
    print("KERNEL_OK")
</pallas_src>

<mosaic_0001>
module attributes {stable_mosaic.version = 11 : i64} {
  func.func @_fused_head_loss_kernel(%arg0: i32, %arg1: memref<8x1024xbf16, #tpu.memory_space<vmem>>, %arg2: memref<1024x384xbf16, #tpu.memory_space<vmem>>, %arg3: memref<1x384xf32, #tpu.memory_space<vmem>>, %arg4: memref<8x32xi32, #tpu.memory_space<vmem>>, %arg5: memref<8x128xf32, #tpu.memory_space<vmem>>, %arg6: memref<8x128xf32, #tpu.memory_space<vmem>>, %arg7: memref<8x128xf32, #tpu.memory_space<vmem>>) attributes {dimension_semantics = [#tpu.dimension_semantics<parallel>], iteration_bounds = array<i64: 1>, scalar_prefetch = 0 : i64, scratch_operands = 0 : i64, tpu.core_type = #tpu.core_type<tc>, window_params = [{transform_indices = @transform_0, window_bounds = array<i64: 8, 1024>}, {pipeline_mode = #tpu.pipeline_mode<synchronous>, transform_indices = @transform_1, window_bounds = array<i64: 1024, 384>}, {pipeline_mode = #tpu.pipeline_mode<synchronous>, transform_indices = @transform_2, window_bounds = array<i64: 1, 384>}, {transform_indices = @transform_3, window_bounds = array<i64: 8, 32>}, {transform_indices = @transform_4, window_bounds = array<i64: 8, 128>}, {transform_indices = @transform_5, window_bounds = array<i64: 8, 128>}, {transform_indices = @transform_6, window_bounds = array<i64: 8, 128>}]} {
    %c0 = arith.constant 0 : index
    %c0_0 = arith.constant 0 : index
    %0 = vector.load %arg1[%c0, %c0_0] : memref<8x1024xbf16, #tpu.memory_space<vmem>>, vector<8x1024xbf16>
    %c0_1 = arith.constant 0 : index
    %c0_2 = arith.constant 0 : index
    %1 = vector.load %arg2[%c0_1, %c0_2] : memref<1024x384xbf16, #tpu.memory_space<vmem>>, vector<1024x384xbf16>
    %cst = arith.constant dense<0.000000e+00> : vector<8x384xf32>
    %2 = tpu.matmul %0, %1, %cst {dimension_numbers = #tpu.dot_dimension_numbers<[1], [0], [0], [1], [0, 0, 1, 1], [], []>} : vector<8x1024xbf16>, vector<1024x384xbf16>, vector<8x384xf32> -> vector<8x384xf32>
    %c0_3 = arith.constant 0 : index
    %c0_4 = arith.constant 0 : index
    %3 = vector.load %arg3[%c0_3, %c0_4] : memref<1x384xf32, #tpu.memory_space<vmem>>, vector<1x384xf32>
    %4 = vector.broadcast %3 : vector<1x384xf32> to vector<8x384xf32>
    %5 = arith.addf %2, %4 : vector<8x384xf32>
    %6 = vector.extract_strided_slice %5 {offsets = [0, 0], sizes = [8, 128], strides = [1, 1]} : vector<8x384xf32> to vector<8x128xf32>
    %c0_5 = arith.constant 0 : index
    %c0_6 = arith.constant 0 : index
    %7 = vector.load %arg6[%c0_5, %c0_6] : memref<8x128xf32, #tpu.memory_space<vmem>>, vector<8x128xf32>
    %8 = arith.subf %6, %7 : vector<8x128xf32>
    %9 = math.absf %8 : vector<8x128xf32>
    %cst_7 = arith.constant 1.000000e+00 : f32
    %10 = vector.broadcast %cst_7 : f32 to vector<8x128xf32>
    %11 = arith.cmpf olt, %9, %10 : vector<8x128xf32>
    %cst_8 = arith.constant 5.000000e-01 : f32
    %12 = vector.broadcast %cst_8 : f32 to vector<8x128xf32>
    %13 = arith.mulf %12, %8 : vector<8x128xf32>
    %14 = arith.mulf %13, %8 : vector<8x128xf32>
    %cst_9 = arith.constant 5.000000e-01 : f32
    %15 = vector.broadcast %cst_9 : f32 to vector<8x128xf32>
    %16 = arith.subf %9, %15 : vector<8x128xf32>
    %17 = arith.select %11, %14, %16 : vector<8x128xi1>, vector<8x128xf32>
    %c0_10 = arith.constant 0 : index
    %c0_11 = arith.constant 0 : index
    %18 = vector.load %arg5[%c0_10, %c0_11] : memref<8x128xf32, #tpu.memory_space<vmem>>, vector<8x128xf32>
    %19 = arith.mulf %17, %18 : vector<8x128xf32>
    %cst_12 = arith.constant dense<0.000000e+00> : vector<8xf32>
    %20 = vector.multi_reduction <add>, %19, %cst_12 [1] : vector<8x128xf32> to vector<8xf32>
    %21 = vector.shape_cast %20 : vector<8xf32> to vector<8x1xf32>
    %c0_13 = arith.constant 0 : index
    %c0_14 = arith.constant 0 : index
    %22 = vector.load %arg4[%c0_13, %c0_14] : memref<8x32xi32, #tpu.memory_space<vmem>>, vector<8x32xi32>
    %23 = vector.extract_strided_slice %5 {offsets = [0, 128], sizes = [8, 32], strides = [1, 1]} : vector<8x384xf32> to vector<8x32xf32>
    %24 = vector.extract_strided_slice %5 {offsets = [0, 160], sizes = [8, 32], strides = [1, 1]} : vector<8x384xf32> to vector<8x32xf32>
    %25 = vector.extract_strided_slice %5 {offsets = [0, 192], sizes = [8, 32], strides = [1, 1]} : vector<8x384xf32> to vector<8x32xf32>
    %26 = vector.extract_strided_slice %5 {offsets = [0, 224], sizes = [8, 32], strides = [1, 1]} : vector<8x384xf32> to vector<8x32xf32>
    %27 = vector.extract_strided_slice %5 {offsets = [0, 256], sizes = [8, 32], strides = [1, 1]} : vector<8x384xf32> to vector<8x32xf32>
    %28 = vector.extract_strided_slice %5 {offsets = [0, 288], sizes = [8, 32], strides = [1, 1]} : vector<8x384xf32> to vector<8x32xf32>
    %29 = vector.extract_strided_slice %5 {offsets = [0, 320], sizes = [8, 32], strides = [1, 1]} : vector<8x384xf32> to vector<8x32xf32>
    %30 = vector.extract_strided_slice %5 {offsets = [0, 352], sizes = [8, 32], strides = [1, 1]} : vector<8x384xf32> to vector<8x32xf32>
    %31 = arith.maximumf %23, %24 : vector<8x32xf32>
    %32 = arith.maximumf %31, %25 : vector<8x32xf32>
    %33 = arith.maximumf %32, %26 : vector<8x32xf32>
    %34 = arith.maximumf %33, %27 : vector<8x32xf32>
    %35 = arith.maximumf %34, %28 : vector<8x32xf32>
    %36 = arith.maximumf %35, %29 : vector<8x32xf32>
    %37 = arith.maximumf %36, %30 : vector<8x32xf32>
    %cst_15 = arith.constant 0.000000e+00 : f32
    %38 = vector.broadcast %cst_15 : f32 to vector<8x32xf32>
    %cst_16 = arith.constant 0.000000e+00 : f32
    %39 = vector.broadcast %cst_16 : f32 to vector<8x32xf32>
    %40 = arith.subf %23, %37 : vector<8x32xf32>
    %41 = math.exp %40 : vector<8x32xf32>
    %42 = arith.addf %38, %41 : vector<8x32xf32>
    %c0_i32 = arith.constant 0 : i32
    %43 = vector.broadcast %c0_i32 : i32 to vector<8x32xi32>
    %44 = arith.cmpi eq, %22, %43 : vector<8x32xi32>
    %cst_17 = arith.constant 0.000000e+00 : f32
    %45 = vector.broadcast %cst_17 : f32 to vector<8x32xf32>
    %46 = arith.select %44, %23, %45 : vector<8x32xi1>, vector<8x32xf32>
    %47 = arith.addf %39, %46 : vector<8x32xf32>
    %48 = arith.subf %24, %37 : vector<8x32xf32>
    %49 = math.exp %48 : vector<8x32xf32>
    %50 = arith.addf %42, %49 : vector<8x32xf32>
    %c1_i32 = arith.constant 1 : i32
    %51 = vector.broadcast %c1_i32 : i32 to vector<8x32xi32>
    %52 = arith.cmpi eq, %22, %51 : vector<8x32xi32>
    %cst_18 = arith.constant 0.000000e+00 : f32
    %53 = vector.broadcast %cst_18 : f32 to vector<8x32xf32>
    %54 = arith.select %52, %24, %53 : vector<8x32xi1>, vector<8x32xf32>
    %55 = arith.addf %47, %54 : vector<8x32xf32>
    %56 = arith.subf %25, %37 : vector<8x32xf32>
    %57 = math.exp %56 : vector<8x32xf32>
    %58 = arith.addf %50, %57 : vector<8x32xf32>
    %c2_i32 = arith.constant 2 : i32
    %59 = vector.broadcast %c2_i32 : i32 to vector<8x32xi32>
    %60 = arith.cmpi eq, %22, %59 : vector<8x32xi32>
    %cst_19 = arith.constant 0.000000e+00 : f32
    %61 = vector.broadcast %cst_19 : f32 to vector<8x32xf32>
    %62 = arith.select %60, %25, %61 : vector<8x32xi1>, vector<8x32xf32>
    %63 = arith.addf %55, %62 : vector<8x32xf32>
    %64 = arith.subf %26, %37 : vector<8x32xf32>
    %65 = math.exp %64 : vector<8x32xf32>
    %66 = arith.addf %58, %65 : vector<8x32xf32>
    %c3_i32 = arith.constant 3 : i32
    %67 = vector.broadcast %c3_i32 : i32 to vector<8x32xi32>
    %68 = arith.cmpi eq, %22, %67 : vector<8x32xi32>
    %cst_20 = arith.constant 0.000000e+00 : f32
    %69 = vector.broadcast %cst_20 : f32 to vector<8x32xf32>
    %70 = arith.select %68, %26, %69 : vector<8x32xi1>, vector<8x32xf32>
    %71 = arith.addf %63, %70 : vector<8x32xf32>
    %72 = arith.subf %27, %37 : vector<8x32xf32>
    %73 = math.exp %72 : vector<8x32xf32>
    %74 = arith.addf %66, %73 : vector<8x32xf32>
    %c4_i32 = arith.constant 4 : i32
    %75 = vector.broadcast %c4_i32 : i32 to vector<8x32xi32>
    %76 = arith.cmpi eq, %22, %75 : vector<8x32xi32>
    %cst_21 = arith.constant 0.000000e+00 : f32
    %77 = vector.broadcast %cst_21 : f32 to vector<8x32xf32>
    %78 = arith.select %76, %27, %77 : vector<8x32xi1>, vector<8x32xf32>
    %79 = arith.addf %71, %78 : vector<8x32xf32>
    %80 = arith.subf %28, %37 : vector<8x32xf32>
    %81 = math.exp %80 : vector<8x32xf32>
    %82 = arith.addf %74, %81 : vector<8x32xf32>
    %c5_i32 = arith.constant 5 : i32
    %83 = vector.broadcast %c5_i32 : i32 to vector<8x32xi32>
    %84 = arith.cmpi eq, %22, %83 : vector<8x32xi32>
    %cst_22 = arith.constant 0.000000e+00 : f32
    %85 = vector.broadcast %cst_22 : f32 to vector<8x32xf32>
    %86 = arith.select %84, %28, %85 : vector<8x32xi1>, vector<8x32xf32>
    %87 = arith.addf %79, %86 : vector<8x32xf32>
    %88 = arith.subf %29, %37 : vector<8x32xf32>
    %89 = math.exp %88 : vector<8x32xf32>
    %90 = arith.addf %82, %89 : vector<8x32xf32>
    %c6_i32 = arith.constant 6 : i32
    %91 = vector.broadcast %c6_i32 : i32 to vector<8x32xi32>
    %92 = arith.cmpi eq, %22, %91 : vector<8x32xi32>
    %cst_23 = arith.constant 0.000000e+00 : f32
    %93 = vector.broadcast %cst_23 : f32 to vector<8x32xf32>
    %94 = arith.select %92, %29, %93 : vector<8x32xi1>, vector<8x32xf32>
    %95 = arith.addf %87, %94 : vector<8x32xf32>
    %96 = arith.subf %30, %37 : vector<8x32xf32>
    %97 = math.exp %96 : vector<8x32xf32>
    %98 = arith.addf %90, %97 : vector<8x32xf32>
    %c7_i32 = arith.constant 7 : i32
    %99 = vector.broadcast %c7_i32 : i32 to vector<8x32xi32>
    %100 = arith.cmpi eq, %22, %99 : vector<8x32xi32>
    %cst_24 = arith.constant 0.000000e+00 : f32
    %101 = vector.broadcast %cst_24 : f32 to vector<8x32xf32>
    %102 = arith.select %100, %30, %101 : vector<8x32xi1>, vector<8x32xf32>
    %103 = arith.addf %95, %102 : vector<8x32xf32>
    %104 = math.log %98 : vector<8x32xf32>
    %105 = arith.addf %104, %37 : vector<8x32xf32>
    %106 = arith.subf %105, %103 : vector<8x32xf32>
    %c0_i32_25 = arith.constant 0 : i32
    %107 = vector.broadcast %c0_i32_25 : i32 to vector<8x32xi32>
    %108 = arith.cmpi sgt, %22, %107 : vector<8x32xi32>
    %cst_26 = arith.constant 1.000000e+00 : f32
    %cst_27 = arith.constant 0.000000e+00 : f32
    %109 = vector.broadcast %cst_26 : f32 to vector<8x32xf32>
    %110 = vector.broadcast %cst_27 : f32 to vector<8x32xf32>
    %111 = arith.select %108, %109, %110 : vector<8x32xi1>, vector<8x32xf32>
    %cst_28 = arith.constant 1.000000e+00 : f32
    %112 = vector.broadcast %cst_28 : f32 to vector<8x32xf32>
    %113 = arith.subf %112, %111 : vector<8x32xf32>
    %114 = arith.mulf %106, %113 : vector<8x32xf32>
    %cst_29 = arith.constant 0.000000e+00 : f32
    %115 = vector.broadcast %cst_29 : f32 to vector<8x32xf32>
    %116 = vector.extract_strided_slice %114 {offsets = [0, 0], sizes = [8, 1], strides = [1, 1]} : vector<8x32xf32> to vector<8x1xf32>
    %117 = vector.broadcast %116 : vector<8x1xf32> to vector<8x32xf32>
    %118 = arith.cmpf ogt, %117, %114 : vector<8x32xf32>
    %cst_30 = arith.constant 1.000000e+00 : f32
    %cst_31 = arith.constant 0.000000e+00 : f32
    %119 = vector.broadcast %cst_30 : f32 to vector<8x32xf32>
    %120 = vector.broadcast %cst_31 : f32 to vector<8x32xf32>
    %121 = arith.select %118, %119, %120 : vector<8x32xi1>, vector<8x32xf32>
    %122 = arith.addf %115, %121 : vector<8x32xf32>
    %123 = vector.extract_strided_slice %114 {offsets = [0, 1], sizes = [8, 1], strides = [1, 1]} : vector<8x32xf32> to vector<8x1xf32>
    %124 = vector.broadcast %123 : vector<8x1xf32> to vector<8x32xf32>
    %125 = arith.cmpf ogt, %124, %114 : vector<8x32xf32>
    %cst_32 = arith.constant 1.000000e+00 : f32
    %cst_33 = arith.constant 0.000000e+00 : f32
    %126 = vector.broadcast %cst_32 : f32 to vector<8x32xf32>
    %127 = vector.broadcast %cst_33 : f32 to vector<8x32xf32>
    %128 = arith.select %125, %126, %127 : vector<8x32xi1>, vector<8x32xf32>
    %129 = arith.addf %122, %128 : vector<8x32xf32>
    %130 = vector.extract_strided_slice %114 {offsets = [0, 2], sizes = [8, 1], strides = [1, 1]} : vector<8x32xf32> to vector<8x1xf32>
    %131 = vector.broadcast %130 : vector<8x1xf32> to vector<8x32xf32>
    %132 = arith.cmpf ogt, %131, %114 : vector<8x32xf32>
    %cst_34 = arith.constant 1.000000e+00 : f32
    %cst_35 = arith.constant 0.000000e+00 : f32
    %133 = vector.broadcast %cst_34 : f32 to vector<8x32xf32>
    %134 = vector.broadcast %cst_35 : f32 to vector<8x32xf32>
    %135 = arith.select %132, %133, %134 : vector<8x32xi1>, vector<8x32xf32>
    %136 = arith.addf %129, %135 : vector<8x32xf32>
    %137 = vector.extract_strided_slice %114 {offsets = [0, 3], sizes = [8, 1], strides = [1, 1]} : vector<8x32xf32> to vector<8x1xf32>
    %138 = vector.broadcast %137 : vector<8x1xf32> to vector<8x32xf32>
    %139 = arith.cmpf ogt, %138, %114 : vector<8x32xf32>
    %cst_36 = arith.constant 1.000000e+00 : f32
    %cst_37 = arith.constant 0.000000e+00 : f32
    %140 = vector.broadcast %cst_36 : f32 to vector<8x32xf32>
    %141 = vector.broadcast %cst_37 : f32 to vector<8x32xf32>
    %142 = arith.select %139, %140, %141 : vector<8x32xi1>, vector<8x32xf32>
    %143 = arith.addf %136, %142 : vector<8x32xf32>
    %144 = vector.extract_strided_slice %114 {offsets = [0, 4], sizes = [8, 1], strides = [1, 1]} : vector<8x32xf32> to vector<8x1xf32>
    %145 = vector.broadcast %144 : vector<8x1xf32> to vector<8x32xf32>
    %146 = arith.cmpf ogt, %145, %114 : vector<8x32xf32>
    %cst_38 = arith.constant 1.000000e+00 : f32
    %cst_39 = arith.constant 0.000000e+00 : f32
    %147 = vector.broadcast %cst_38 : f32 to vector<8x32xf32>
    %148 = vector.broadcast %cst_39 : f32 to vector<8x32xf32>
    %149 = arith.select %146, %147, %148 : vector<8x32xi1>, vector<8x32xf32>
    %150 = arith.addf %143, %149 : vector<8x32xf32>
    %151 = vector.extract_strided_slice %114 {offsets = [0, 5], sizes = [8, 1], strides = [1, 1]} : vector<8x32xf32> to vector<8x1xf32>
    %152 = vector.broadcast %151 : vector<8x1xf32> to vector<8x32xf32>
    %153 = arith.cmpf ogt, %152, %114 : vector<8x32xf32>
    %cst_40 = arith.constant 1.000000e+00 : f32
    %cst_41 = arith.constant 0.000000e+00 : f32
    %154 = vector.broadcast %cst_40 : f32 to vector<8x32xf32>
    %155 = vector.broadcast %cst_41 : f32 to vector<8x32xf32>
    %156 = arith.select %153, %154, %155 : vector<8x32xi1>, vector<8x32xf32>
    %157 = arith.addf %150, %156 : vector<8x32xf32>
    %158 = vector.extract_strided_slice %114 {offsets = [0, 6], sizes = [8, 1], strides = [1, 1]} : vector<8x32xf32> to vector<8x1xf32>
    %159 = vector.broadcast %158 : vector<8x1xf32> to vector<8x32xf32>
    %160 = arith.cmpf ogt, %159, %114 : vector<8x32xf32>
    %cst_42 = arith.constant 1.000000e+00 : f32
    %cst_43 = arith.constant 0.000000e+00 : f32
    %161 = vector.broadcast %cst_42 : f32 to vector<8x32xf32>
    %162 = vector.broadcast %cst_43 : f32 to vector<8x32xf32>
    %163 = arith.select %160, %161, %162 : vector<8x32xi1>, vector<8x32xf32>
    %164 = arith.addf %157, %163 : vector<8x32xf32>
    %165 = vector.extract_strided_slice %114 {offsets = [0, 7], sizes = [8, 1], strides = [1, 1]} : vector<8x32xf32> to vector<8x1xf32>
    %166 = vector.broadcast %165 : vector<8x1xf32> to vector<8x32xf32>
    %167 = arith.cmpf ogt, %166, %114 : vector<8x32xf32>
    %cst_44 = arith.constant 1.000000e+00 : f32
    %cst_45 = arith.constant 0.000000e+00 : f32
    %168 = vector.broadcast %cst_44 : f32 to vector<8x32xf32>
    %169 = vector.broadcast %cst_45 : f32 to vector<8x32xf32>
    %170 = arith.select %167, %168, %169 : vector<8x32xi1>, vector<8x32xf32>
    %171 = arith.addf %164, %170 : vector<8x32xf32>
    %172 = vector.extract_strided_slice %114 {offsets = [0, 8], sizes = [8, 1], strides = [1, 1]} : vector<8x32xf32> to vector<8x1xf32>
    %173 = vector.broadcast %172 : vector<8x1xf32> to vector<8x32xf32>
    %174 = arith.cmpf ogt, %173, %114 : vector<8x32xf32>
    %cst_46 = arith.constant 1.000000e+00 : f32
    %cst_47 = arith.constant 0.000000e+00 : f32
    %175 = vector.broadcast %cst_46 : f32 to vector<8x32xf32>
    %176 = vector.broadcast %cst_47 : f32 to vector<8x32xf32>
    %177 = arith.select %174, %175, %176 : vector<8x32xi1>, vector<8x32xf32>
    %178 = arith.addf %171, %177 : vector<8x32xf32>
    %179 = vector.extract_strided_slice %114 {offsets = [0, 9], sizes = [8, 1], strides = [1, 1]} : vector<8x32xf32> to vector<8x1xf32>
    %180 = vector.broadcast %179 : vector<8x1xf32> to vector<8x32xf32>
    %181 = arith.cmpf ogt, %180, %114 : vector<8x32xf32>
    %cst_48 = arith.constant 1.000000e+00 : f32
    %cst_49 = arith.constant 0.000000e+00 : f32
    %182 = vector.broadcast %cst_48 : f32 to vector<8x32xf32>
    %183 = vector.broadcast %cst_49 : f32 to vector<8x32xf32>
    %184 = arith.select %181, %182, %183 : vector<8x32xi1>, vector<8x32xf32>
    %185 = arith.addf %178, %184 : vector<8x32xf32>
    %186 = vector.extract_strided_slice %114 {offsets = [0, 10], sizes = [8, 1], strides = [1, 1]} : vector<8x32xf32> to vector<8x1xf32>
    %187 = vector.broadcast %186 : vector<8x1xf32> to vector<8x32xf32>
    %188 = arith.cmpf ogt, %187, %114 : vector<8x32xf32>
    %cst_50 = arith.constant 1.000000e+00 : f32
    %cst_51 = arith.constant 0.000000e+00 : f32
    %189 = vector.broadcast %cst_50 : f32 to vector<8x32xf32>
    %190 = vector.broadcast %cst_51 : f32 to vector<8x32xf32>
    %191 = arith.select %188, %189, %190 : vector<8x32xi1>, vector<8x32xf32>
    %192 = arith.addf %185, %191 : vector<8x32xf32>
    %193 = vector.extract_strided_slice %114 {offsets = [0, 11], sizes = [8, 1], strides = [1, 1]} : vector<8x32xf32> to vector<8x1xf32>
    %194 = vector.broadcast %193 : vector<8x1xf32> to vector<8x32xf32>
    %195 = arith.cmpf ogt, %194, %114 : vector<8x32xf32>
    %cst_52 = arith.constant 1.000000e+00 : f32
    %cst_53 = arith.constant 0.000000e+00 : f32
    %196 = vector.broadcast %cst_52 : f32 to vector<8x32xf32>
    %197 = vector.broadcast %cst_53 : f32 to vector<8x32xf32>
    %198 = arith.select %195, %196, %197 : vector<8x32xi1>, vector<8x32xf32>
    %199 = arith.addf %192, %198 : vector<8x32xf32>
    %200 = vector.extract_strided_slice %114 {offsets = [0, 12], sizes = [8, 1], strides = [1, 1]} : vector<8x32xf32> to vector<8x1xf32>
    %201 = vector.broadcast %200 : vector<8x1xf32> to vector<8x32xf32>
    %202 = arith.cmpf ogt, %201, %114 : vector<8x32xf32>
    %cst_54 = arith.constant 1.000000e+00 : f32
    %cst_55 = arith.constant 0.000000e+00 : f32
    %203 = vector.broadcast %cst_54 : f32 to vector<8x32xf32>
    %204 = vector.broadcast %cst_55 : f32 to vector<8x32xf32>
    %205 = arith.select %202, %203, %204 : vector<8x32xi1>, vector<8x32xf32>
    %206 = arith.addf %199, %205 : vector<8x32xf32>
    %207 = vector.extract_strided_slice %114 {offsets = [0, 13], sizes = [8, 1], strides = [1, 1]} : vector<8x32xf32> to vector<8x1xf32>
    %208 = vector.broadcast %207 : vector<8x1xf32> to vector<8x32xf32>
    %209 = arith.cmpf ogt, %208, %114 : vector<8x32xf32>
    %cst_56 = arith.constant 1.000000e+00 : f32
    %cst_57 = arith.constant 0.000000e+00 : f32
    %210 = vector.broadcast %cst_56 : f32 to vector<8x32xf32>
    %211 = vector.broadcast %cst_57 : f32 to vector<8x32xf32>
    %212 = arith.select %209, %210, %211 : vector<8x32xi1>, vector<8x32xf32>
    %213 = arith.addf %206, %212 : vector<8x32xf32>
    %214 = vector.extract_strided_slice %114 {offsets = [0, 14], sizes = [8, 1], strides = [1, 1]} : vector<8x32xf32> to vector<8x1xf32>
    %215 = vector.broadcast %214 : vector<8x1xf32> to vector<8x32xf32>
    %216 = arith.cmpf ogt, %215, %114 : vector<8x32xf32>
    %cst_58 = arith.constant 1.000000e+00 : f32
    %cst_59 = arith.constant 0.000000e+00 : f32
    %217 = vector.broadcast %cst_58 : f32 to vector<8x32xf32>
    %218 = vector.broadcast %cst_59 : f32 to vector<8x32xf32>
    %219 = arith.select %216, %217, %218 : vector<8x32xi1>, vector<8x32xf32>
    %220 = arith.addf %213, %219 : vector<8x32xf32>
    %221 = vector.extract_strided_slice %114 {offsets = [0, 15], sizes = [8, 1], strides = [1, 1]} : vector<8x32xf32> to vector<8x1xf32>
    %222 = vector.broadcast %221 : vector<8x1xf32> to vector<8x32xf32>
    %223 = arith.cmpf ogt, %222, %114 : vector<8x32xf32>
    %cst_60 = arith.constant 1.000000e+00 : f32
    %cst_61 = arith.constant 0.000000e+00 : f32
    %224 = vector.broadcast %cst_60 : f32 to vector<8x32xf32>
    %225 = vector.broadcast %cst_61 : f32 to vector<8x32xf32>
    %226 = arith.select %223, %224, %225 : vector<8x32xi1>, vector<8x32xf32>
    %227 = arith.addf %220, %226 : vector<8x32xf32>
    %228 = vector.extract_strided_slice %114 {offsets = [0, 16], sizes = [8, 1], strides = [1, 1]} : vector<8x32xf32> to vector<8x1xf32>
    %229 = vector.broadcast %228 : vector<8x1xf32> to vector<8x32xf32>
    %230 = arith.cmpf ogt, %229, %114 : vector<8x32xf32>
    %cst_62 = arith.constant 1.000000e+00 : f32
    %cst_63 = arith.constant 0.000000e+00 : f32
    %231 = vector.broadcast %cst_62 : f32 to vector<8x32xf32>
    %232 = vector.broadcast %cst_63 : f32 to vector<8x32xf32>
    %233 = arith.select %230, %231, %232 : vector<8x32xi1>, vector<8x32xf32>
    %234 = arith.addf %227, %233 : vector<8x32xf32>
    %235 = vector.extract_strided_slice %114 {offsets = [0, 17], sizes = [8, 1], strides = [1, 1]} : vector<8x32xf32> to vector<8x1xf32>
    %236 = vector.broadcast %235 : vector<8x1xf32> to vector<8x32xf32>
    %237 = arith.cmpf ogt, %236, %114 : vector<8x32xf32>
    %cst_64 = arith.constant 1.000000e+00 : f32
    %cst_65 = arith.constant 0.000000e+00 : f32
    %238 = vector.broadcast %cst_64 : f32 to vector<8x32xf32>
    %239 = vector.broadcast %cst_65 : f32 to vector<8x32xf32>
    %240 = arith.select %237, %238, %239 : vector<8x32xi1>, vector<8x32xf32>
    %241 = arith.addf %234, %240 : vector<8x32xf32>
    %242 = vector.extract_strided_slice %114 {offsets = [0, 18], sizes = [8, 1], strides = [1, 1]} : vector<8x32xf32> to vector<8x1xf32>
    %243 = vector.broadcast %242 : vector<8x1xf32> to vector<8x32xf32>
    %244 = arith.cmpf ogt, %243, %114 : vector<8x32xf32>
    %cst_66 = arith.constant 1.000000e+00 : f32
    %cst_67 = arith.constant 0.000000e+00 : f32
    %245 = vector.broadcast %cst_66 : f32 to vector<8x32xf32>
    %246 = vector.broadcast %cst_67 : f32 to vector<8x32xf32>
    %247 = arith.select %244, %245, %246 : vector<8x32xi1>, vector<8x32xf32>
    %248 = arith.addf %241, %247 : vector<8x32xf32>
    %249 = vector.extract_strided_slice %114 {offsets = [0, 19], sizes = [8, 1], strides = [1, 1]} : vector<8x32xf32> to vector<8x1xf32>
    %250 = vector.broadcast %249 : vector<8x1xf32> to vector<8x32xf32>
    %251 = arith.cmpf ogt, %250, %114 : vector<8x32xf32>
    %cst_68 = arith.constant 1.000000e+00 : f32
    %cst_69 = arith.constant 0.000000e+00 : f32
    %252 = vector.broadcast %cst_68 : f32 to vector<8x32xf32>
    %253 = vector.broadcast %cst_69 : f32 to vector<8x32xf32>
    %254 = arith.select %251, %252, %253 : vector<8x32xi1>, vector<8x32xf32>
    %255 = arith.addf %248, %254 : vector<8x32xf32>
    %256 = vector.extract_strided_slice %114 {offsets = [0, 20], sizes = [8, 1], strides = [1, 1]} : vector<8x32xf32> to vector<8x1xf32>
    %257 = vector.broadcast %256 : vector<8x1xf32> to vector<8x32xf32>
    %258 = arith.cmpf ogt, %257, %114 : vector<8x32xf32>
    %cst_70 = arith.constant 1.000000e+00 : f32
    %cst_71 = arith.constant 0.000000e+00 : f32
    %259 = vector.broadcast %cst_70 : f32 to vector<8x32xf32>
    %260 = vector.broadcast %cst_71 : f32 to vector<8x32xf32>
    %261 = arith.select %258, %259, %260 : vector<8x32xi1>, vector<8x32xf32>
    %262 = arith.addf %255, %261 : vector<8x32xf32>
    %263 = vector.extract_strided_slice %114 {offsets = [0, 21], sizes = [8, 1], strides = [1, 1]} : vector<8x32xf32> to vector<8x1xf32>
    %264 = vector.broadcast %263 : vector<8x1xf32> to vector<8x32xf32>
    %265 = arith.cmpf ogt, %264, %114 : vector<8x32xf32>
    %cst_72 = arith.constant 1.000000e+00 : f32
    %cst_73 = arith.constant 0.000000e+00 : f32
    %266 = vector.broadcast %cst_72 : f32 to vector<8x32xf32>
    %267 = vector.broadcast %cst_73 : f32 to vector<8x32xf32>
    %268 = arith.select %265, %266, %267 : vector<8x32xi1>, vector<8x32xf32>
    %269 = arith.addf %262, %268 : vector<8x32xf32>
    %270 = vector.extract_strided_slice %114 {offsets = [0, 22], sizes = [8, 1], strides = [1, 1]} : vector<8x32xf32> to vector<8x1xf32>
    %271 = vector.broadcast %270 : vector<8x1xf32> to vector<8x32xf32>
    %272 = arith.cmpf ogt, %271, %114 : vector<8x32xf32>
    %cst_74 = arith.constant 1.000000e+00 : f32
    %cst_75 = arith.constant 0.000000e+00 : f32
    %273 = vector.broadcast %cst_74 : f32 to vector<8x32xf32>
    %274 = vector.broadcast %cst_75 : f32 to vector<8x32xf32>
    %275 = arith.select %272, %273, %274 : vector<8x32xi1>, vector<8x32xf32>
    %276 = arith.addf %269, %275 : vector<8x32xf32>
    %277 = vector.extract_strided_slice %114 {offsets = [0, 23], sizes = [8, 1], strides = [1, 1]} : vector<8x32xf32> to vector<8x1xf32>
    %278 = vector.broadcast %277 : vector<8x1xf32> to vector<8x32xf32>
    %279 = arith.cmpf ogt, %278, %114 : vector<8x32xf32>
    %cst_76 = arith.constant 1.000000e+00 : f32
    %cst_77 = arith.constant 0.000000e+00 : f32
    %280 = vector.broadcast %cst_76 : f32 to vector<8x32xf32>
    %281 = vector.broadcast %cst_77 : f32 to vector<8x32xf32>
    %282 = arith.select %279, %280, %281 : vector<8x32xi1>, vector<8x32xf32>
    %283 = arith.addf %276, %282 : vector<8x32xf32>
    %284 = vector.extract_strided_slice %114 {offsets = [0, 24], sizes = [8, 1], strides = [1, 1]} : vector<8x32xf32> to vector<8x1xf32>
    %285 = vector.broadcast %284 : vector<8x1xf32> to vector<8x32xf32>
    %286 = arith.cmpf ogt, %285, %114 : vector<8x32xf32>
    %cst_78 = arith.constant 1.000000e+00 : f32
    %cst_79 = arith.constant 0.000000e+00 : f32
    %287 = vector.broadcast %cst_78 : f32 to vector<8x32xf32>
    %288 = vector.broadcast %cst_79 : f32 to vector<8x32xf32>
    %289 = arith.select %286, %287, %288 : vector<8x32xi1>, vector<8x32xf32>
    %290 = arith.addf %283, %289 : vector<8x32xf32>
    %291 = vector.extract_strided_slice %114 {offsets = [0, 25], sizes = [8, 1], strides = [1, 1]} : vector<8x32xf32> to vector<8x1xf32>
    %292 = vector.broadcast %291 : vector<8x1xf32> to vector<8x32xf32>
    %293 = arith.cmpf ogt, %292, %114 : vector<8x32xf32>
    %cst_80 = arith.constant 1.000000e+00 : f32
    %cst_81 = arith.constant 0.000000e+00 : f32
    %294 = vector.broadcast %cst_80 : f32 to vector<8x32xf32>
    %295 = vector.broadcast %cst_81 : f32 to vector<8x32xf32>
    %296 = arith.select %293, %294, %295 : vector<8x32xi1>, vector<8x32xf32>
    %297 = arith.addf %290, %296 : vector<8x32xf32>
    %298 = vector.extract_strided_slice %114 {offsets = [0, 26], sizes = [8, 1], strides = [1, 1]} : vector<8x32xf32> to vector<8x1xf32>
    %299 = vector.broadcast %298 : vector<8x1xf32> to vector<8x32xf32>
    %300 = arith.cmpf ogt, %299, %114 : vector<8x32xf32>
    %cst_82 = arith.constant 1.000000e+00 : f32
    %cst_83 = arith.constant 0.000000e+00 : f32
    %301 = vector.broadcast %cst_82 : f32 to vector<8x32xf32>
    %302 = vector.broadcast %cst_83 : f32 to vector<8x32xf32>
    %303 = arith.select %300, %301, %302 : vector<8x32xi1>, vector<8x32xf32>
    %304 = arith.addf %297, %303 : vector<8x32xf32>
    %305 = vector.extract_strided_slice %114 {offsets = [0, 27], sizes = [8, 1], strides = [1, 1]} : vector<8x32xf32> to vector<8x1xf32>
    %306 = vector.broadcast %305 : vector<8x1xf32> to vector<8x32xf32>
    %307 = arith.cmpf ogt, %306, %114 : vector<8x32xf32>
    %cst_84 = arith.constant 1.000000e+00 : f32
    %cst_85 = arith.constant 0.000000e+00 : f32
    %308 = vector.broadcast %cst_84 : f32 to vector<8x32xf32>
    %309 = vector.broadcast %cst_85 : f32 to vector<8x32xf32>
    %310 = arith.select %307, %308, %309 : vector<8x32xi1>, vector<8x32xf32>
    %311 = arith.addf %304, %310 : vector<8x32xf32>
    %312 = vector.extract_strided_slice %114 {offsets = [0, 28], sizes = [8, 1], strides = [1, 1]} : vector<8x32xf32> to vector<8x1xf32>
    %313 = vector.broadcast %312 : vector<8x1xf32> to vector<8x32xf32>
    %314 = arith.cmpf ogt, %313, %114 : vector<8x32xf32>
    %cst_86 = arith.constant 1.000000e+00 : f32
    %cst_87 = arith.constant 0.000000e+00 : f32
    %315 = vector.broadcast %cst_86 : f32 to vector<8x32xf32>
    %316 = vector.broadcast %cst_87 : f32 to vector<8x32xf32>
    %317 = arith.select %314, %315, %316 : vector<8x32xi1>, vector<8x32xf32>
    %318 = arith.addf %311, %317 : vector<8x32xf32>
    %319 = vector.extract_strided_slice %114 {offsets = [0, 29], sizes = [8, 1], strides = [1, 1]} : vector<8x32xf32> to vector<8x1xf32>
    %320 = vector.broadcast %319 : vector<8x1xf32> to vector<8x32xf32>
    %321 = arith.cmpf ogt, %320, %114 : vector<8x32xf32>
    %cst_88 = arith.constant 1.000000e+00 : f32
    %cst_89 = arith.constant 0.000000e+00 : f32
    %322 = vector.broadcast %cst_88 : f32 to vector<8x32xf32>
    %323 = vector.broadcast %cst_89 : f32 to vector<8x32xf32>
    %324 = arith.select %321, %322, %323 : vector<8x32xi1>, vector<8x32xf32>
    %325 = arith.addf %318, %324 : vector<8x32xf32>
    %326 = vector.extract_strided_slice %114 {offsets = [0, 30], sizes = [8, 1], strides = [1, 1]} : vector<8x32xf32> to vector<8x1xf32>
    %327 = vector.broadcast %326 : vector<8x1xf32> to vector<8x32xf32>
    %328 = arith.cmpf ogt, %327, %114 : vector<8x32xf32>
    %cst_90 = arith.constant 1.000000e+00 : f32
    %cst_91 = arith.constant 0.000000e+00 : f32
    %329 = vector.broadcast %cst_90 : f32 to vector<8x32xf32>
    %330 = vector.broadcast %cst_91 : f32 to vector<8x32xf32>
    %331 = arith.select %328, %329, %330 : vector<8x32xi1>, vector<8x32xf32>
    %332 = arith.addf %325, %331 : vector<8x32xf32>
    %333 = vector.extract_strided_slice %114 {offsets = [0, 31], sizes = [8, 1], strides = [1, 1]} : vector<8x32xf32> to vector<8x1xf32>
    %334 = vector.broadcast %333 : vector<8x1xf32> to vector<8x32xf32>
    %335 = arith.cmpf ogt, %334, %114 : vector<8x32xf32>
    %cst_92 = arith.constant 1.000000e+00 : f32
    %cst_93 = arith.constant 0.000000e+00 : f32
    %336 = vector.broadcast %cst_92 : f32 to vector<8x32xf32>
    %337 = vector.broadcast %cst_93 : f32 to vector<8x32xf32>
    %338 = arith.select %335, %336, %337 : vector<8x32xi1>, vector<8x32xf32>
    %339 = arith.addf %332, %338 : vector<8x32xf32>
    %cst_94 = arith.constant dense<0.000000e+00> : vector<8xf32>
    %340 = vector.multi_reduction <add>, %111, %cst_94 [1] : vector<8x32xf32> to vector<8xf32>
    %341 = vector.shape_cast %340 : vector<8xf32> to vector<8x1xf32>
    %cst_95 = arith.constant 3.000000e+00 : f32
    %342 = vector.broadcast %cst_95 : f32 to vector<8x1xf32>
    %343 = arith.mulf %342, %341 : vector<8x1xf32>
    %cst_96 = arith.constant 3.100000e+01 : f32
    %344 = vector.broadcast %cst_96 : f32 to vector<8x1xf32>
    %345 = arith.minimumf %343, %344 : vector<8x1xf32>
    %cst_97 = arith.constant 0.000000e+00 : f32
    %346 = vector.broadcast %cst_97 : f32 to vector<8x32xf32>
    %347 = arith.cmpf ogt, %111, %346 : vector<8x32xf32>
    %348 = vector.broadcast %345 : vector<8x1xf32> to vector<8x32xf32>
    %349 = arith.cmpf olt, %339, %348 : vector<8x32xf32>
    %350 = arith.ori %347, %349 : vector<8x32xi1>
    %cst_98 = arith.constant 1.000000e+00 : f32
    %cst_99 = arith.constant 0.000000e+00 : f32
    %351 = vector.broadcast %cst_98 : f32 to vector<8x32xf32>
    %352 = vector.broadcast %cst_99 : f32 to vector<8x32xf32>
    %353 = arith.select %350, %351, %352 : vector<8x32xi1>, vector<8x32xf32>
    %354 = arith.mulf %106, %353 : vector<8x32xf32>
    %cst_100 = arith.constant dense<0.000000e+00> : vector<8xf32>
    %355 = vector.multi_reduction <add>, %354, %cst_100 [1] : vector<8x32xf32> to vector<8xf32>
    %356 = vector.shape_cast %355 : vector<8xf32> to vector<8x1xf32>
    %357 = tpu.iota {dimensions = array<i32: 1>} : vector<8x128xi32>
    %c0_i32_101 = arith.constant 0 : i32
    %358 = vector.broadcast %c0_i32_101 : i32 to vector<8x128xi32>
    %359 = arith.cmpi eq, %357, %358 : vector<8x128xi32>
    %c1_i32_102 = arith.constant 1 : i32
    %360 = vector.broadcast %c1_i32_102 : i32 to vector<8x128xi32>
    %361 = arith.cmpi eq, %357, %360 : vector<8x128xi32>
    %cst_103 = arith.constant 0.000000e+00 : f32
    %362 = vector.shape_cast %356 : vector<8x1xf32> to vector<8x1xf32>
    %363 = vector.broadcast %362 : vector<8x1xf32> to vector<8x128xf32>
    %364 = vector.broadcast %cst_103 : f32 to vector<8x128xf32>
    %365 = arith.select %361, %363, %364 : vector<8x128xi1>, vector<8x128xf32>
    %366 = vector.shape_cast %21 : vector<8x1xf32> to vector<8x1xf32>
    %367 = vector.broadcast %366 : vector<8x1xf32> to vector<8x128xf32>
    %368 = arith.select %359, %367, %365 : vector<8x128xi1>, vector<8x128xf32>
    %c0_104 = arith.constant 0 : index
    %c0_105 = arith.constant 0 : index
    %369 = vector.load %arg7[%c0_104, %c0_105] : memref<8x128xf32, #tpu.memory_space<vmem>>, vector<8x128xf32>
    tpu.vector_store %arg7[%c0_104, %c0_105], %368 {strides = array<i32>} : memref<8x128xf32, #tpu.memory_space<vmem>>, vector<8x128xf32>,
    return
  }
  func.func @transform_0(%arg0: i32) -> (i32, i32) {
    %c0_i32 = arith.constant 0 : i32
    %c0_i32_0 = arith.constant 0 : i32
    return %arg0, %c0_i32 : i32, i32
  }
  func.func @transform_1(%arg0: i32) -> (i32, i32) {
    %c0_i32 = arith.constant 0 : i32
    %c0_i32_0 = arith.constant 0 : i32
    %c0_i32_1 = arith.constant 0 : i32
    return %c0_i32, %c0_i32_0 : i32, i32
  }
  func.func @transform_2(%arg0: i32) -> (i32, i32) {
    %c0_i32 = arith.constant 0 : i32
    %c0_i32_0 = arith.constant 0 : i32
    %c0_i32_1 = arith.constant 0 : i32
    return %c0_i32, %c0_i32_0 : i32, i32
  }
  func.func @transform_3(%arg0: i32) -> (i32, i32) {
    %c0_i32 = arith.constant 0 : i32
    %c0_i32_0 = arith.constant 0 : i32
    return %arg0, %c0_i32 : i32, i32
  }
  func.func @transform_4(%arg0: i32) -> (i32, i32) {
    %c0_i32 = arith.constant 0 : i32
    %c0_i32_0 = arith.constant 0 : i32
    return %arg0, %c0_i32 : i32, i32
  }
  func.func @transform_5(%arg0: i32) -> (i32, i32) {
    %c0_i32 = arith.constant 0 : i32
    %c0_i32_0 = arith.constant 0 : i32
    return %arg0, %c0_i32 : i32, i32
  }
  func.func @transform_6(%arg0: i32) -> (i32, i32) {
    %c0_i32 = arith.constant 0 : i32
    %c0_i32_0 = arith.constant 0 : i32
    return %arg0, %c0_i32 : i32, i32
  }
}

</mosaic_0001>

<bundles_post_ra>
// kernel: netwithloss_forward.1
= control target key start
LH: loop header
LB: loop body
LE: loop exit
PB: predicated region body
PF: predicated region fallthrough
CT: control target
= control target key end

     0   :  { %s3091_s8 = smov 32   ;;  %s3092_s9 = smov 64   ;;  %vm2018_vm10 = vcmask 261120   ;;  %s4565_s1 = inlined_call_operand.vmem [shape: bf16[1024,384], index: 1, kind: input, shape index: {}]   ;;  %s4566_s0 = inlined_call_operand.vmem [shape: bf16[8,1024], index: 0, kind: input, shape index: {}]   ;;  %s4567_s2 = inlined_call_operand.vmem [shape: f32[1,384], index: 2, kind: input, shape index: {}]   ;;  %s4568_s3 = inlined_call_operand.vmem [shape: s32[8,32], index: 3, kind: input, shape index: {}]   ;;  %s4569_s5 = inlined_call_operand.vmem [shape: f32[8,128], index: 5, kind: input, shape index: {}]   ;;  %s4570_s4 = inlined_call_operand.vmem [shape: f32[8,128], index: 4, kind: input, shape index: {}]   ;;  %s4571_s6 = inlined_call_operand.vmem [shape: f32[8,128], index: 6, kind: output, shape index: {}]  }
   0x1   :  { %v2129_v0 = vld [vmem:[%s4565_s1 + $0xa8] sm:$0xf]  ;;  %v2834_v1 = vld [vmem:[%s4565_s1 + $0xb0] sm:$0xf0]  ;;  %v2117_v11 = vld [vmem:[%s4565_s1 + $0x90] sm:$0xf] }
   0x2   :  { %v2225_v2 = vld [vmem:[%s4565_s1 + $0x168] sm:$0xf]  ;;  %v2130_v3 = vor.u32 %v2834_v1, %v2129_v0  ;;  %v2858_v4 = vld [vmem:[%s4565_s1 + $0x170] sm:$0xf0]  ;;  %v2831_v13 = vld [vmem:[%s4565_s1 + $0x98] sm:$0xf0] }
   0x3   :  { %v2321_v5 = vld [vmem:[%s4565_s1 + $0x228] sm:$0xf]  ;;  %v2882_v6 = vld [vmem:[%s4565_s1 + $0x230] sm:$0xf0]  ;;  %v2226_v7 = vor.u32 %v2858_v4, %v2225_v2  ;;  %v2213_v14 = vld [vmem:[%s4565_s1 + $0x150] sm:$0xf]  ;;  %v2118_v16 = vor.u32 %v2831_v13, %v2117_v11 }
   0x4   :  { %v2322_v8 = vor.u32 %v2882_v6, %v2321_v5  ;;  %v2417_v9 = vld [vmem:[%s4565_s1 + $0x2e8] sm:$0xf]  ;;  %v2906_v10 = vld [vmem:[%s4565_s1 + $0x2f0] sm:$0xf0]  ;;  %1343 = vmatpush.bf16.msra.mxu0 %v2130_v3  ;;  %v2855_v15 = vld [vmem:[%s4565_s1 + $0x158] sm:$0xf0] }
   0x5   :  { %v2418_v12 = vor.u32 %v2906_v10, %v2417_v9  ;;  %1356 = vmatpush.bf16.msra.mxu1 %v2226_v7  ;;  %v2214_v17 = vor.u32 %v2855_v15, %v2213_v14  ;;  %v2309_v18 = vld [vmem:[%s4565_s1 + $0x210] sm:$0xf]  ;;  %v2879_v19 = vld [vmem:[%s4565_s1 + $0x218] sm:$0xf0]  ;;  %v2105_v23 = vld [vmem:[%s4565_s1 + $0x78] sm:$0xf] }
   0x6   :  { %1369 = vmatpush.bf16.msra.mxu2 %v2322_v8  ;;  %v2405_v20 = vld [vmem:[%s4565_s1 + $0x2d0] sm:$0xf]  ;;  %v2310_v21 = vor.u32 %v2879_v19, %v2309_v18  ;;  %v2903_v22 = vld [vmem:[%s4565_s1 + $0x2d8] sm:$0xf0]  ;;  %v2828_v24 = vld [vmem:[%s4565_s1 + $0x80] sm:$0xf0] }
   0x7   :  { %1382 = vmatpush.bf16.msra.mxu3 %v2418_v12  ;;  %v2406_v25 = vor.u32 %v2903_v22, %v2405_v20  ;;  %v2201_v26 = vld [vmem:[%s4565_s1 + $0x138] sm:$0xf]  ;;  %v2852_v27 = vld [vmem:[%s4565_s1 + $0x140] sm:$0xf0]  ;;  %v2106_v29 = vor.u32 %v2828_v24, %v2105_v23  ;;  %v2093_v35 = vld [vmem:[%s4565_s1 + $0x60] sm:$0xf] }
   0x8   :  { %v2297_v28 = vld [vmem:[%s4565_s1 + $0x1f8] sm:$0xf]  ;;  %1344 = vmatpush.bf16.msra.mxu0 %v2118_v16  ;;  %v2876_v30 = vld [vmem:[%s4565_s1 + $0x200] sm:$0xf0]  ;;  %v2202_v33 = vor.u32 %v2852_v27, %v2201_v26  ;;  %v2825_v36 = vld [vmem:[%s4565_s1 + $0x68] sm:$0xf0] }
   0x9   :  { %v2393_v31 = vld [vmem:[%s4565_s1 + $0x2b8] sm:$0xf]  ;;  %v2900_v32 = vld [vmem:[%s4565_s1 + $0x2c0] sm:$0xf0]  ;;  %1357 = vmatpush.bf16.msra.mxu1 %v2214_v17  ;;  %v2298_v34 = vor.u32 %v2876_v30, %v2297_v28  ;;  %v2189_v37 = vld [vmem:[%s4565_s1 + $0x120] sm:$0xf]  ;;  %v2094_v44 = vor.u32 %v2825_v36, %v2093_v35 }
   0xa   :  { %1370 = vmatpush.bf16.msra.mxu2 %v2310_v21  ;;  %v2394_v38 = vor.u32 %v2900_v32, %v2393_v31  ;;  %v2849_v39 = vld [vmem:[%s4565_s1 + $0x128] sm:$0xf0]  ;;  %v2285_v40 = vld [vmem:[%s4565_s1 + $0x1e0] sm:$0xf]  ;;  %v2081_v47 = vld [vmem:[%s4565_s1 + $0x48] sm:$0xf] }
   0xb   :  { %1383 = vmatpush.bf16.msra.mxu3 %v2406_v25  ;;  %v2873_v41 = vld [vmem:[%s4565_s1 + $0x1e8] sm:$0xf0]  ;;  %v2381_v42 = vld [vmem:[%s4565_s1 + $0x2a0] sm:$0xf]  ;;  %v2190_v45 = vor.u32 %v2849_v39, %v2189_v37  ;;  %v2822_v48 = vld [vmem:[%s4565_s1 + $0x50] sm:$0xf0] }
   0xc   :  { %v2897_v43 = vld [vmem:[%s4565_s1 + $0x2a8] sm:$0xf0]  ;;  %1345 = vmatpush.bf16.msra.mxu0 %v2106_v29  ;;  %v2286_v46 = vor.u32 %v2873_v41, %v2285_v40  ;;  %v2177_v49 = vld [vmem:[%s4565_s1 + $0x108] sm:$0xf]  ;;  %v2846_v51 = vld [vmem:[%s4565_s1 + $0x110] sm:$0xf0]  ;;  %v2082_v56 = vor.u32 %v2822_v48, %v2081_v47 }
   0xd   :  { %1358 = vmatpush.bf16.msra.mxu1 %v2202_v33  ;;  %v2382_v50 = vor.u32 %v2897_v43, %v2381_v42  ;;  %v2273_v52 = vld [vmem:[%s4565_s1 + $0x1c8] sm:$0xf]  ;;  %v2870_v53 = vld [vmem:[%s4565_s1 + $0x1d0] sm:$0xf0]  ;;  %v2178_v57 = vor.u32 %v2846_v51, %v2177_v49  ;;  %v2069_v59 = vld [vmem:[%s4565_s1 + $0x30] sm:$0xf] }
   0xe   :  { %1371 = vmatpush.bf16.msra.mxu2 %v2298_v34  ;;  %v2369_v54 = vld [vmem:[%s4565_s1 + $0x288] sm:$0xf]  ;;  %v2894_v55 = vld [vmem:[%s4565_s1 + $0x290] sm:$0xf0]  ;;  %v2274_v58 = vor.u32 %v2870_v53, %v2273_v52  ;;  %v2819_v60 = vld [vmem:[%s4565_s1 + $0x38] sm:$0xf0] }
   0xf   :  { %1384 = vmatpush.bf16.msra.mxu3 %v2394_v38  ;;  %v2165_v61 = vld [vmem:[%s4565_s1 + $0xf0] sm:$0xf]  ;;  %v2370_v62 = vor.u32 %v2894_v55, %v2369_v54  ;;  %v2843_v63 = vld [vmem:[%s4565_s1 + $0xf8] sm:$0xf0]  ;;  %v2070_v4 = vor.u32 %v2819_v60, %v2069_v59  ;;  %v2057_v7 = vld [vmem:[%s4565_s1 + $0x18] sm:$0xf] }
  0x10   :  { %1346 = vmatpush.bf16.msra.mxu0 %v2094_v44  ;;  %v2261_v0 = vld [vmem:[%s4565_s1 + $0x1b0] sm:$0xf]  ;;  %v2867_v1 = vld [vmem:[%s4565_s1 + $0x1b8] sm:$0xf0]  ;;  %v2166_v5 = vor.u32 %v2843_v63, %v2165_v61  ;;  %v2816_v8 = vld [vmem:[%s4565_s1 + $0x20] sm:$0xf0] }
  0x11   :  { %1359 = vmatpush.bf16.msra.mxu1 %v2190_v45  ;;  %v2357_v2 = vld [vmem:[%s4565_s1 + $0x270] sm:$0xf]  ;;  %v2891_v3 = vld [vmem:[%s4565_s1 + $0x278] sm:$0xf0]  ;;  %v2262_v6 = vor.u32 %v2867_v1, %v2261_v0  ;;  %v2153_v9 = vld [vmem:[%s4565_s1 + $0xd8] sm:$0xf]  ;;  %v2058_v16 = vor.u32 %v2816_v8, %v2057_v7 }
  0x12   :  { %1372 = vmatpush.bf16.msra.mxu2 %v2286_v46  ;;  %v2358_v10 = vor.u32 %v2891_v3, %v2357_v2  ;;  %v2840_v11 = vld [vmem:[%s4565_s1 + $0xe0] sm:$0xf0]  ;;  %v2249_v12 = vld [vmem:[%s4565_s1 + $0x198] sm:$0xf]  ;;  %v2045_v17 = vld [vmem:[%s4565_s1] sm:$0xf] }
  0x13   :  { %1385 = vmatpush.bf16.msra.mxu3 %v2382_v50  ;;  %v2864_v13 = vld [vmem:[%s4565_s1 + $0x1a0] sm:$0xf0]  ;;  %v2345_v14 = vld [vmem:[%s4565_s1 + $0x258] sm:$0xf]  ;;  %v2813_v18 = vld [vmem:[%s4565_s1 + $0x8] sm:$0xf0]  ;;  %v2154_v19 = vor.u32 %v2840_v11, %v2153_v9 }
  0x14   :  { %1347 = vmatpush.bf16.msra.mxu0 %v2082_v56  ;;  %v2888_v15 = vld [vmem:[%s4565_s1 + $0x260] sm:$0xf0]  ;;  %v2250_v20 = vor.u32 %v2864_v13, %v2249_v12  ;;  %v2141_v21 = vld [vmem:[%s4565_s1 + $0xc0] sm:$0xf]  ;;  %v2837_v22 = vld [vmem:[%s4565_s1 + $0xc8] sm:$0xf0]  ;;  %v2046_v31 = vor.u32 %v2813_v18, %v2045_v17 }
  0x15   :  { %1360 = vmatpush.bf16.msra.mxu1 %v2178_v57  ;;  %v2237_v23 = vld [vmem:[%s4565_s1 + $0x180] sm:$0xf]  ;;  %v2346_v24 = vor.u32 %v2888_v15, %v2345_v14  ;;  %v2861_v25 = vld [vmem:[%s4565_s1 + $0x188] sm:$0xf0]  ;;  %v2513_v28 = vld [vmem:[%s4565_s1 + $0x3a8] sm:$0xf]  ;;  %v2142_v35 = vor.u32 %v2837_v22, %v2141_v21 }
  0x16   :  { %1373 = vmatpush.bf16.msra.mxu2 %v2274_v58  ;;  %v2333_v26 = vld [vmem:[%s4565_s1 + $0x240] sm:$0xf]  ;;  %v2885_v27 = vld [vmem:[%s4565_s1 + $0x248] sm:$0xf0]  ;;  %v2930_v29 = vld [vmem:[%s4565_s1 + $0x3b0] sm:$0xf0]  ;;  %v2238_v36 = vor.u32 %v2861_v25, %v2237_v23 }
  0x17   :  { %1386 = vmatpush.bf16.msra.mxu3 %v2370_v62  ;;  %v2609_v30 = vld [vmem:[%s4565_s1 + $0x468] sm:$0xf]  ;;  %v2954_v32 = vld [vmem:[%s4565_s1 + $0x470] sm:$0xf0]  ;;  %v2334_v39 = vor.u32 %v2885_v27, %v2333_v26  ;;  %v2514_v40 = vor.u32 %v2930_v29, %v2513_v28  ;;  %v2501_v43 = vld [vmem:[%s4565_s1 + $0x390] sm:$0xf] }
  0x18   :  { %1348 = vmatpush.bf16.msra.mxu0 %v2070_v4  ;;  %v2705_v33 = vld [vmem:[%s4565_s1 + $0x528] sm:$0xf]  ;;  %v2978_v34 = vld [vmem:[%s4565_s1 + $0x530] sm:$0xf0]  ;;  %v2610_v41 = vor.u32 %v2954_v32, %v2609_v30  ;;  %v2927_v44 = vld [vmem:[%s4565_s1 + $0x398] sm:$0xf0] }
  0x19   :  { %1361 = vmatpush.bf16.msra.mxu1 %v2166_v5  ;;  %v2801_v37 = vld [vmem:[%s4565_s1 + $0x5e8] sm:$0xf]  ;;  %v3002_v38 = vld [vmem:[%s4565_s1 + $0x5f0] sm:$0xf0]  ;;  %v2706_v42 = vor.u32 %v2978_v34, %v2705_v33  ;;  %v2597_v45 = vld [vmem:[%s4565_s1 + $0x450] sm:$0xf]  ;;  %v2502_v52 = vor.u32 %v2927_v44, %v2501_v43 }
  0x1a   :  { %1374 = vmatpush.bf16.msra.mxu2 %v2262_v6  ;;  %v2802_v46 = vor.u32 %v3002_v38, %v2801_v37  ;;  %v2951_v47 = vld [vmem:[%s4565_s1 + $0x458] sm:$0xf0]  ;;  %v2693_v48 = vld [vmem:[%s4565_s1 + $0x510] sm:$0xf]  ;;  %v2489_v53 = vld [vmem:[%s4565_s1 + $0x378] sm:$0xf] }
  0x1b   :  { %1387 = vmatpush.bf16.msra.mxu3 %v2358_v10  ;;  %v2975_v49 = vld [vmem:[%s4565_s1 + $0x518] sm:$0xf0]  ;;  %v2789_v50 = vld [vmem:[%s4565_s1 + $0x5d0] sm:$0xf]  ;;  %v2598_v54 = vor.u32 %v2951_v47, %v2597_v45  ;;  %v2924_v56 = vld [vmem:[%s4565_s1 + $0x380] sm:$0xf0] }
  0x1c   :  { %1349 = vmatpush.bf16.msra.mxu0 %v2058_v16  ;;  %v2999_v51 = vld [vmem:[%s4565_s1 + $0x5d8] sm:$0xf0]  ;;  %v2694_v55 = vor.u32 %v2975_v49, %v2693_v48  ;;  %v2585_v57 = vld [vmem:[%s4565_s1 + $0x438] sm:$0xf]  ;;  %v24_v58 = vld [vmem:[%s4566_s0 + $0x8] sm:$0xff]  ;;  %v2490_v3 = vor.u32 %v2924_v56, %v2489_v53 }
  0x1d   :  { %1362 = vmatpush.bf16.msra.mxu1 %v2154_v19  ;;  %v2790_v59 = vor.u32 %v2999_v51, %v2789_v50  ;;  %v2948_v60 = vld [vmem:[%s4565_s1 + $0x440] sm:$0xf0]  ;;  %v2681_v61 = vld [vmem:[%s4565_s1 + $0x4f8] sm:$0xf]  ;;  %v297_v63 = vunpack.c.l.b16 %v24_v58  ;;  %v298_v0 = vunpack.c.h.b16 %v24_v58  ;;  %v2477_v9 = vld [vmem:[%s4565_s1 + $0x360] sm:$0xf] }
  0x1e   :  { %1375 = vmatpush.bf16.msra.mxu2 %v2250_v20  ;;  %v2972_v62 = vld [vmem:[%s4565_s1 + $0x500] sm:$0xf0]  ;;  %v2777_v1 = vld [vmem:[%s4565_s1 + $0x5b8] sm:$0xf]  ;;  %v2586_v7 = vor.u32 %v2948_v60, %v2585_v57  ;;  %v2921_v10 = vld [vmem:[%s4565_s1 + $0x368] sm:$0xf0] }
  0x1f   :  { %1388 = vmatpush.bf16.msra.mxu3 %v2346_v24  ;;  %v2996_v2 = vld [vmem:[%s4565_s1 + $0x5c0] sm:$0xf0]  ;;  %v3428_v4 = vpack.c.b16 %v297_v63, %v297_v63  ;;  %v3433_v6 = vpack.c.b16 %v298_v0, %v298_v0  ;;  %v2682_v8 = vor.u32 %v2972_v62, %v2681_v61  ;;  %v2573_v11 = vld [vmem:[%s4565_s1 + $0x420] sm:$0xf]  ;;  %v2945_v15 = vld [vmem:[%s4565_s1 + $0x428] sm:$0xf0]  ;;  %v2478_v22 = vor.u32 %v2921_v10, %v2477_v9 }
  0x20   :  { %1350 = vmatpush.bf16.msra.mxu0 %v2046_v31  ;;  %v23_v5 = vld [vmem:[%s4566_s0] sm:$0xff]  ;;  %v2778_v14 = vor.u32 %v2996_v2, %v2777_v1  ;;  %v2969_v17 = vld [vmem:[%s4565_s1 + $0x4e8] sm:$0xf0]  ;;  %v2574_v23 = vor.u32 %v2945_v15, %v2573_v11  ;;  %v2465_v25 = vld [vmem:[%s4565_s1 + $0x348] sm:$0xf] }
  0x21   :  { %1363 = vmatpush.bf16.msra.mxu1 %v2142_v35  ;;  %v295_v12 = vunpack.c.l.b16 %v23_v5  ;;  %v296_v13 = vunpack.c.h.b16 %v23_v5  ;;  %v2669_v16 = vld [vmem:[%s4565_s1 + $0x4e0] sm:$0xf]  ;;  %v2993_v19 = vld [vmem:[%s4565_s1 + $0x5a8] sm:$0xf0]  ;;  %v2918_v26 = vld [vmem:[%s4565_s1 + $0x350] sm:$0xf0] }
  0x22   :  { %1376 = vmatpush.bf16.msra.mxu2 %v2238_v36  ;;  %v2765_v18 = vld [vmem:[%s4565_s1 + $0x5a0] sm:$0xf]  ;;  %v2670_v24 = vor.u32 %v2969_v17, %v2669_v16  ;;  %v2561_v27 = vld [vmem:[%s4565_s1 + $0x408] sm:$0xf]  ;;  %v2942_v29 = vld [vmem:[%s4565_s1 + $0x410] sm:$0xf0]  ;;  %v2466_v34 = vor.u32 %v2918_v26, %v2465_v25 }
  0x23   :  { %1389 = vmatpush.bf16.msra.mxu3 %v2334_v39  ;;  %v3460_v20 = vpack.c.b16 %v295_v12, %v295_v12  ;;  %v3463_v21 = vpack.c.b16 %v296_v13, %v296_v13  ;;  %v2766_v28 = vor.u32 %v2993_v19, %v2765_v18  ;;  %v2657_v30 = vld [vmem:[%s4565_s1 + $0x4c8] sm:$0xf]  ;;  %v2966_v31 = vld [vmem:[%s4565_s1 + $0x4d0] sm:$0xf0]  ;;  %v2562_v35 = vor.u32 %v2942_v29, %v2561_v27  ;;  %v2453_v37 = vld [vmem:[%s4565_s1 + $0x330] sm:$0xf] }
  0x24   :  { %1395 = vmatpush.bf16.msrb.mxu0 %v2514_v40  ;;  %v2753_v32 = vld [vmem:[%s4565_s1 + $0x588] sm:$0xf]  ;;  %v2990_v33 = vld [vmem:[%s4565_s1 + $0x590] sm:$0xf0]  ;;  %v2658_v36 = vor.u32 %v2966_v31, %v2657_v30  ;;  %v2915_v38 = vld [vmem:[%s4565_s1 + $0x338] sm:$0xf0] }
  0x25   :  { %1408 = vmatpush.bf16.msrb.mxu1 %v2610_v41  ;;  %1377 = vmatmul.bf16.vlgmr.msra.gmra.mxu2 %v3428_v4  ;;  %v2549_v39 = vld [vmem:[%s4565_s1 + $0x3f0] sm:$0xf]  ;;  %v2754_v40 = vor.u32 %v2990_v33, %v2753_v32  ;;  %v2939_v41 = vld [vmem:[%s4565_s1 + $0x3f8] sm:$0xf0]  ;;  %v2441_v49 = vld [vmem:[%s4565_s1 + $0x318] sm:$0xf] }
  0x26   :  { %1421 = vmatpush.bf16.msrb.mxu2 %v2706_v42  ;;  %1390 = vmatmul.bf16.vlgmr.msra.gmra.mxu3 %v3433_v6  ;;  %v2645_v42 = vld [vmem:[%s4565_s1 + $0x4b0] sm:$0xf]  ;;  %v2963_v43 = vld [vmem:[%s4565_s1 + $0x4b8] sm:$0xf0]  ;;  %v2550_v47 = vor.u32 %v2939_v41, %v2549_v39  ;;  %v2912_v50 = vld [vmem:[%s4565_s1 + $0x320] sm:$0xf0] }
  0x27   :  { %1434 = vmatpush.bf16.msrb.mxu3 %v2802_v46  ;;  %1351 = vmatmul.bf16.vlgmr.msra.gmra.mxu0 %v3460_v20  ;;  %v2741_v44 = vld [vmem:[%s4565_s1 + $0x570] sm:$0xf]  ;;  %v2987_v45 = vld [vmem:[%s4565_s1 + $0x578] sm:$0xf0]  ;;  %v2454_v46 = vor.u32 %v2915_v38, %v2453_v37  ;;  %v2646_v48 = vor.u32 %v2963_v43, %v2645_v42  ;;  %v2537_v51 = vld [vmem:[%s4565_s1 + $0x3d8] sm:$0xf] }
  0x28   :  { %1396 = vmatpush.bf16.msrb.mxu0 %v2502_v52  ;;  %1364 = vmatmul.bf16.vlgmr.msra.gmra.mxu1 %v3463_v21  ;;  %v2742_v52 = vor.u32 %v2987_v45, %v2741_v44  ;;  %v2936_v53 = vld [vmem:[%s4565_s1 + $0x3e0] sm:$0xf0]  ;;  %v2729_v56 = vld [vmem:[%s4565_s1 + $0x558] sm:$0xf]  ;;  %v2429_v58 = vld [vmem:[%s4565_s1 + $0x300] sm:$0xf] }
  0x29   :  { %1409 = vmatpush.bf16.msrb.mxu1 %v2598_v54  ;;  %v2633_v54 = vld [vmem:[%s4565_s1 + $0x498] sm:$0xf]  ;;  %v2984_v57 = vld [vmem:[%s4565_s1 + $0x560] sm:$0xf0]  ;;  %v2909_v60 = vld [vmem:[%s4565_s1 + $0x308] sm:$0xf0]  ;;  %v2538_v63 = vor.u32 %v2936_v53, %v2537_v51 }
  0x2a   :  { %1422 = vmatpush.bf16.msrb.mxu2 %v2694_v55  ;;  %v2960_v55 = vld [vmem:[%s4565_s1 + $0x4a0] sm:$0xf0]  ;;  %v2525_v61 = vld [vmem:[%s4565_s1 + $0x3c0] sm:$0xf]  ;;  %v2933_v62 = vld [vmem:[%s4565_s1 + $0x3c8] sm:$0xf0]  ;;  %v2730_v5 = vor.u32 %v2984_v57, %v2729_v56  ;;  %v2430_v13 = vor.u32 %v2909_v60, %v2429_v58 }
  0x2b   :  { %1435 = vmatpush.bf16.msrb.mxu3 %v2790_v59  ;;  %v2442_v59 = vor.u32 %v2912_v50, %v2441_v49  ;;  %v2634_v0 = vor.u32 %v2960_v55, %v2633_v54  ;;  %v2621_v1 = vld [vmem:[%s4565_s1 + $0x480] sm:$0xf]  ;;  %v2957_v2 = vld [vmem:[%s4565_s1 + $0x488] sm:$0xf0]  ;;  %v25_v9 = vld [vmem:[%s4566_s0 + $0x10] sm:$0xff]  ;;  %v2526_v18 = vor.u32 %v2933_v62, %v2525_v61 }
  0x2c   :  { %1397 = vmatpush.bf16.msrb.mxu0 %v2490_v3  ;;  %v26_v3 = vld [vmem:[%s4566_s0 + $0x18] sm:$0xff]  ;;  %v2833_v10 = vld [vmem:[%s4565_s1 + $0xac] sm:$0xf]  ;;  %v2622_v19 = vor.u32 %v2957_v2, %v2621_v1  ;;  %v2830_v31 = vld [vmem:[%s4565_s1 + $0x94] sm:$0xf] }
  0x2d   :  { %1410 = vmatpush.bf16.msrb.mxu1 %v2586_v7  ;;  %v2717_v7 = vld [vmem:[%s4565_s1 + $0x540] sm:$0xf]  ;;  %v2131_v11 = vld [vmem:[%s4565_s1 + $0xb4] sm:$0xf0]  ;;  %v2857_v12 = vld [vmem:[%s4565_s1 + $0x16c] sm:$0xf]  ;;  %v301_v17 = vunpack.c.l.b16 %v26_v3  ;;  %v302_v25 = vunpack.c.h.b16 %v26_v3 }
  0x2e   :  { %1423 = vmatpush.bf16.msrb.mxu2 %v2682_v8  ;;  %v2981_v8 = vld [vmem:[%s4565_s1 + $0x548] sm:$0xf0]  ;;  %v2323_v16 = vld [vmem:[%s4565_s1 + $0x234] sm:$0xf0]  ;;  %v2134_v27 = vor.u32 %v2833_v10, %v2131_v11  ;;  %v2119_v32 = vld [vmem:[%s4565_s1 + $0x9c] sm:$0xf0] }
  0x2f   :  { %1436 = vmatpush.bf16.msrb.mxu3 %v2778_v14  ;;  %v2227_v14 = vld [vmem:[%s4565_s1 + $0x174] sm:$0xf0]  ;;  %v2881_v15 = vld [vmem:[%s4565_s1 + $0x22c] sm:$0xf]  ;;  %v2718_v26 = vor.u32 %v2981_v8, %v2717_v7  ;;  %v2854_v33 = vld [vmem:[%s4565_s1 + $0x154] sm:$0xf]  ;;  %v3611_v38 = vpack.c.b16 %v301_v17, %v301_v17  ;;  %v3621_v42 = vpack.c.b16 %v302_v25, %v302_v25  ;;  %v2122_v43 = vor.u32 %v2830_v31, %v2119_v32 }
  0x30   :  { %1398 = vmatpush.bf16.msrb.mxu0 %v2478_v22  ;;  %v2905_v22 = vld [vmem:[%s4565_s1 + $0x2ec] sm:$0xf]  ;;  %v2230_v29 = vor.u32 %v2857_v12, %v2227_v14  ;;  %v2326_v30 = vor.u32 %v2881_v15, %v2323_v16  ;;  %v2311_v37 = vld [vmem:[%s4565_s1 + $0x21c] sm:$0xf0]  ;;  %v2902_v39 = vld [vmem:[%s4565_s1 + $0x2d4] sm:$0xf] }
  0x31   :  { %1411 = vmatpush.bf16.msrb.mxu1 %v2574_v23  ;;  %v2419_v23 = vld [vmem:[%s4565_s1 + $0x2f4] sm:$0xf0]  ;;  %v2851_v49 = vld [vmem:[%s4565_s1 + $0x13c] sm:$0xf]  ;;  %v2203_v51 = vld [vmem:[%s4565_s1 + $0x144] sm:$0xf0] }
  0x32   :  { %1424 = vmatpush.bf16.msrb.mxu2 %v2670_v24  ;;  %v299_v24 = vunpack.c.l.b16 %v25_v9  ;;  %v2299_v53 = vld [vmem:[%s4565_s1 + $0x204] sm:$0xf0]  ;;  %v2899_v54 = vld [vmem:[%s4565_s1 + $0x2bc] sm:$0xf]  ;;  %v2206_v57 = vor.u32 %v2851_v49, %v2203_v51  ;;  %v2095_v60 = vld [vmem:[%s4565_s1 + $0x6c] sm:$0xf0] }
  0x33   :  { %1437 = vmatpush.bf16.msrb.mxu3 %v2766_v28  ;;  %v300_v28 = vunpack.c.h.b16 %v25_v9  ;;  %v2395_v55 = vld [vmem:[%s4565_s1 + $0x2c4] sm:$0xf0]  ;;  %v2848_v61 = vld [vmem:[%s4565_s1 + $0x124] sm:$0xf]  ;;  %v2287_v1 = vld [vmem:[%s4565_s1 + $0x1ec] sm:$0xf0] }
  0x34   :  { %1399 = vmatpush.bf16.msrb.mxu0 %v2466_v34  ;;  %v2422_v34 = vor.u32 %v2905_v22, %v2419_v23  ;;  %v3619_v41 = vpack.c.b16 %v299_v24, %v299_v24  ;;  %v2398_v62 = vor.u32 %v2899_v54, %v2395_v55  ;;  %v2896_v2 = vld [vmem:[%s4565_s1 + $0x2a4] sm:$0xf]  ;;  %v2383_v3 = vld [vmem:[%s4565_s1 + $0x2ac] sm:$0xf0]  ;;  %v2821_v9 = vld [vmem:[%s4565_s1 + $0x4c] sm:$0xf] }
  0x35   :  { %1412 = vmatpush.bf16.msrb.mxu1 %v2562_v35  ;;  %v2215_v35 = vld [vmem:[%s4565_s1 + $0x15c] sm:$0xf0]  ;;  %v3623_v44 = vpack.c.b16 %v300_v28, %v300_v28  ;;  %v2083_v10 = vld [vmem:[%s4565_s1 + $0x54] sm:$0xf0]  ;;  %v2845_v11 = vld [vmem:[%s4565_s1 + $0x10c] sm:$0xf]  ;;  %v2386_v12 = vor.u32 %v2896_v2, %v2383_v3 }
  0x36   :  { %1425 = vmatpush.bf16.msrb.mxu2 %v2658_v36  ;;  %v2878_v36 = vld [vmem:[%s4565_s1 + $0x214] sm:$0xf]  ;;  %v2218_v45 = vor.u32 %v2854_v33, %v2215_v35  ;;  %v2869_v14 = vld [vmem:[%s4565_s1 + $0x1cc] sm:$0xf]  ;;  %v2275_v15 = vld [vmem:[%s4565_s1 + $0x1d4] sm:$0xf0] }
  0x37   :  { %1438 = vmatpush.bf16.msrb.mxu3 %v2754_v40  ;;  %v2407_v40 = vld [vmem:[%s4565_s1 + $0x2dc] sm:$0xf0]  ;;  %v2893_v16 = vld [vmem:[%s4565_s1 + $0x28c] sm:$0xf]  ;;  %v2371_v17 = vld [vmem:[%s4565_s1 + $0x294] sm:$0xf0]  ;;  %v2278_v22 = vor.u32 %v2869_v14, %v2275_v15 }
  0x38   :  { %1400 = vmatpush.bf16.msrb.mxu0 %v2454_v46  ;;  %v2314_v46 = vor.u32 %v2878_v36, %v2311_v37  ;;  %v2410_v50 = vor.u32 %v2902_v39, %v2407_v40  ;;  %v2818_v23 = vld [vmem:[%s4565_s1 + $0x34] sm:$0xf]  ;;  %v2071_v24 = vld [vmem:[%s4565_s1 + $0x3c] sm:$0xf0]  ;;  %v2815_v35 = vld [vmem:[%s4565_s1 + $0x1c] sm:$0xf] }
  0x39   :  { %1413 = vmatpush.bf16.msrb.mxu1 %v2550_v47  ;;  %v2827_v47 = vld [vmem:[%s4565_s1 + $0x7c] sm:$0xf]  ;;  %v2842_v25 = vld [vmem:[%s4565_s1 + $0xf4] sm:$0xf]  ;;  %v2359_v31 = vld [vmem:[%s4565_s1 + $0x27c] sm:$0xf0]  ;;  %v2074_v32 = vor.u32 %v2818_v23, %v2071_v24 }
  0x3a   :  { %1426 = vmatpush.bf16.msrb.mxu2 %v2646_v48  ;;  %v2107_v48 = vld [vmem:[%s4565_s1 + $0x84] sm:$0xf0]  ;;  %v2866_v28 = vld [vmem:[%s4565_s1 + $0x1b4] sm:$0xf]  ;;  %v2839_v37 = vld [vmem:[%s4565_s1 + $0xdc] sm:$0xf] }
  0x3b   :  { %1439 = vmatpush.bf16.msrb.mxu3 %v2742_v52  ;;  %v2875_v52 = vld [vmem:[%s4565_s1 + $0x1fc] sm:$0xf]  ;;  %v2110_v56 = vor.u32 %v2827_v47, %v2107_v48  ;;  %v2059_v36 = vld [vmem:[%s4565_s1 + $0x24] sm:$0xf0]  ;;  %v2812_v49 = vld [vmem:[%s4565_s1 + $0x4] sm:$0xf] }
  0x3c   :  { %1401 = vmatpush.bf16.msrb.mxu0 %v2442_v59  ;;  %v2302_v58 = vor.u32 %v2875_v52, %v2299_v53  ;;  %v2824_v59 = vld [vmem:[%s4565_s1 + $0x64] sm:$0xf]  ;;  %v2155_v40 = vld [vmem:[%s4565_s1 + $0xe4] sm:$0xf0]  ;;  %v2062_v48 = vor.u32 %v2815_v35, %v2059_v36  ;;  %v2143_v54 = vld [vmem:[%s4565_s1 + $0xcc] sm:$0xf0] }
  0x3d   :  { %1414 = vmatpush.bf16.msrb.mxu1 %v2538_v63  ;;  %v2191_v63 = vld [vmem:[%s4565_s1 + $0x12c] sm:$0xf0]  ;;  %v2347_v47 = vld [vmem:[%s4565_s1 + $0x264] sm:$0xf0]  ;;  %v2158_v51 = vor.u32 %v2839_v37, %v2155_v40  ;;  %v2836_v53 = vld [vmem:[%s4565_s1 + $0xc4] sm:$0xf] }
  0x3e   :  { %1427 = vmatpush.bf16.msrb.mxu2 %v2634_v0  ;;  %v2872_v0 = vld [vmem:[%s4565_s1 + $0x1e4] sm:$0xf]  ;;  %v2194_v7 = vor.u32 %v2848_v61, %v2191_v63  ;;  %v2515_v61 = vld [vmem:[%s4565_s1 + $0x3b4] sm:$0xf0]  ;;  %v2146_v3 = vor.u32 %v2836_v53, %v2143_v54  ;;  %v2503_v14 = vld [vmem:[%s4565_s1 + $0x39c] sm:$0xf0] }
  0x3f   :  { %1440 = vmatpush.bf16.msrb.mxu3 %v2730_v5  ;;  %v2098_v5 = vor.u32 %v2824_v59, %v2095_v60  ;;  %v2290_v8 = vor.u32 %v2872_v0, %v2287_v1  ;;  %v2860_v55 = vld [vmem:[%s4565_s1 + $0x184] sm:$0xf]  ;;  %v2335_v59 = vld [vmem:[%s4565_s1 + $0x24c] sm:$0xf0]  ;;  %v2929_v60 = vld [vmem:[%s4565_s1 + $0x3ac] sm:$0xf] }
  0x40   :  { %1402 = vmatpush.bf16.msrb.mxu0 %v2430_v13  ;;  %v2179_v13 = vld [vmem:[%s4565_s1 + $0x114] sm:$0xf0]  ;;  %v2977_v1 = vld [vmem:[%s4565_s1 + $0x52c] sm:$0xf]  ;;  %v2950_v15 = vld [vmem:[%s4565_s1 + $0x454] sm:$0xf] }
  0x41   :  { %1415 = vmatpush.bf16.msrb.mxu1 %v2526_v18  ;;  %v2086_v18 = vor.u32 %v2821_v9, %v2083_v10  ;;  %v2611_v0 = vld [vmem:[%s4565_s1 + $0x474] sm:$0xf0]  ;;  %v2518_v10 = vor.u32 %v2929_v60, %v2515_v61  ;;  %v2791_v23 = vld [vmem:[%s4565_s1 + $0x5dc] sm:$0xf0]  ;;  %v2779_v35 = vld [vmem:[%s4565_s1 + $0x5c4] sm:$0xf0] }
  0x42   :  { %1428 = vmatpush.bf16.msrb.mxu2 %v2622_v19  ;;  %v2182_v19 = vor.u32 %v2845_v11, %v2179_v13  ;;  %v2707_v2 = vld [vmem:[%s4565_s1 + $0x534] sm:$0xf0]  ;;  %v2926_v13 = vld [vmem:[%s4565_s1 + $0x394] sm:$0xf]  ;;  %v2920_v40 = vld [vmem:[%s4565_s1 + $0x364] sm:$0xf] }
  0x43   :  { %1441 = vmatpush.bf16.msrb.mxu3 %v2718_v26  ;;  %1403 = vmatmul.bf16.vlgmr.msrb.gmra.mxu0 %v3619_v41  ;;  %v2374_v26 = vor.u32 %v2893_v16, %v2371_v17  ;;  %v2599_v17 = vld [vmem:[%s4565_s1 + $0x45c] sm:$0xf0]  ;;  %v2506_v24 = vor.u32 %v2926_v13, %v2503_v14  ;;  %v2965_v60 = vld [vmem:[%s4565_s1 + $0x4cc] sm:$0xf]  ;;  %v2659_v61 = vld [vmem:[%s4565_s1 + $0x4d4] sm:$0xf0] }
  0x44   :  { %1447 = vmatpush.bf16.msra.mxu0 %v2134_v27  ;;  %1416 = vmatmul.bf16.vlgmr.msrb.gmra.mxu1 %v3623_v44  ;;  %v2167_v27 = vld [vmem:[%s4565_s1 + $0xfc] sm:$0xf0] }
  0x45   :  { %1460 = vmatpush.bf16.msra.mxu1 %v2230_v29  ;;  %1429 = vmatmul.bf16.vlgmr.msrb.gmra.mxu2 %v3611_v38  ;;  %v2263_v29 = vld [vmem:[%s4565_s1 + $0x1bc] sm:$0xf0]  ;;  %v2170_v33 = vor.u32 %v2842_v25, %v2167_v27  ;;  %v2602_v25 = vor.u32 %v2950_v15, %v2599_v17  ;;  %v2923_v27 = vld [vmem:[%s4565_s1 + $0x37c] sm:$0xf] }
  0x46   :  { %1473 = vmatpush.bf16.msra.mxu2 %v2326_v30  ;;  %1442 = vmatmul.bf16.vlgmr.msrb.gmra.mxu3 %v3621_v42  ;;  %v2890_v30 = vld [vmem:[%s4565_s1 + $0x274] sm:$0xf]  ;;  %v2743_v13 = vld [vmem:[%s4565_s1 + $0x57c] sm:$0xf0]  ;;  %v2911_v17 = vld [vmem:[%s4565_s1 + $0x31c] sm:$0xf] }
  0x47   :  { %1486 = vmatpush.bf16.msra.mxu3 %v2422_v34  ;;  %v2266_v34 = vor.u32 %v2866_v28, %v2263_v29  ;;  %v2362_v39 = vor.u32 %v2890_v30, %v2359_v31  ;;  %v2491_v28 = vld [vmem:[%s4565_s1 + $0x384] sm:$0xf0]  ;;  %v2947_v29 = vld [vmem:[%s4565_s1 + $0x43c] sm:$0xf] }
  0x48   :  { %1448 = vmatpush.bf16.msra.mxu0 %v2122_v43  ;;  %v2863_v43 = vld [vmem:[%s4565_s1 + $0x19c] sm:$0xf]  ;;  %v2587_v31 = vld [vmem:[%s4565_s1 + $0x444] sm:$0xf0]  ;;  %v2494_v36 = vor.u32 %v2923_v27, %v2491_v28 }
  0x49   :  { %1461 = vmatpush.bf16.msra.mxu1 %v2218_v45  ;;  %v2251_v45 = vld [vmem:[%s4565_s1 + $0x1a4] sm:$0xf0]  ;;  %v2590_v37 = vor.u32 %v2947_v29, %v2587_v31  ;;  %v2908_v29 = vld [vmem:[%s4565_s1 + $0x304] sm:$0xf] }
  0x4a   :  { %1474 = vmatpush.bf16.msra.mxu2 %v2314_v46  ;;  %v2887_v46 = vld [vmem:[%s4565_s1 + $0x25c] sm:$0xf]  ;;  %v2254_v52 = vor.u32 %v2863_v43, %v2251_v45  ;;  %v2479_v43 = vld [vmem:[%s4565_s1 + $0x36c] sm:$0xf0]  ;;  %v2944_v45 = vld [vmem:[%s4565_s1 + $0x424] sm:$0xf] }
  0x4b   :  { %1487 = vmatpush.bf16.msra.mxu3 %v2410_v50  ;;  %v2047_v50 = vld [vmem:[%s4565_s1 + $0xc] sm:$0xf0]  ;;  %v2731_v27 = vld [vmem:[%s4565_s1 + $0x564] sm:$0xf0] }
  0x4c   :  { %1449 = vmatpush.bf16.msra.mxu0 %v2110_v56  ;;  %v2350_v56 = vor.u32 %v2887_v46, %v2347_v47  ;;  %v2050_v63 = vor.u32 %v2812_v49, %v2047_v50  ;;  %v2575_v47 = vld [vmem:[%s4565_s1 + $0x42c] sm:$0xf0]  ;;  %v2992_v50 = vld [vmem:[%s4565_s1 + $0x5a4] sm:$0xf] }
  0x4d   :  { %1462 = vmatpush.bf16.msra.mxu1 %v2206_v57  ;;  %v2239_v57 = vld [vmem:[%s4565_s1 + $0x18c] sm:$0xf0]  ;;  %v2578_v53 = vor.u32 %v2944_v45, %v2575_v47  ;;  %v2835_v45 = vld [vmem:[%s4565_s1 + $0xb8] sm:$0xf0] }
  0x4e   :  { %1475 = vmatpush.bf16.msra.mxu2 %v2302_v58  ;;  %v2884_v58 = vld [vmem:[%s4565_s1 + $0x244] sm:$0xf]  ;;  %v2671_v49 = vld [vmem:[%s4565_s1 + $0x4ec] sm:$0xf0] }
  0x4f   :  { %1488 = vmatpush.bf16.msra.mxu3 %v2398_v62  ;;  %v2953_v62 = vld [vmem:[%s4565_s1 + $0x46c] sm:$0xf]  ;;  %v2338_v9 = vor.u32 %v2884_v58, %v2335_v59  ;;  %v2563_v59 = vld [vmem:[%s4565_s1 + $0x414] sm:$0xf0] }
  0x50   :  { %1450 = vmatpush.bf16.msra.mxu0 %v2098_v5  ;;  %v2242_v5 = vor.u32 %v2860_v55, %v2239_v57  ;;  %v2614_v11 = vor.u32 %v2953_v62, %v2611_v0  ;;  %v2917_v55 = vld [vmem:[%s4565_s1 + $0x34c] sm:$0xf] }
  0x51   :  { %1463 = vmatpush.bf16.msra.mxu1 %v2194_v7  ;;  %v3001_v7 = vld [vmem:[%s4565_s1 + $0x5ec] sm:$0xf] }
  0x52   :  { %1476 = vmatpush.bf16.msra.mxu2 %v2290_v8  ;;  %v2803_v8 = vld [vmem:[%s4565_s1 + $0x5f4] sm:$0xf0]  ;;  %v2941_v57 = vld [vmem:[%s4565_s1 + $0x40c] sm:$0xf] }
  0x53   :  { %1489 = vmatpush.bf16.msra.mxu3 %v2386_v12  ;;  %v2710_v12 = vor.u32 %v2977_v1, %v2707_v2  ;;  %v2806_v16 = vor.u32 %v3001_v7, %v2803_v8  ;;  %v2989_v62 = vld [vmem:[%s4565_s1 + $0x58c] sm:$0xf]  ;;  %v2566_v1 = vor.u32 %v2941_v57, %v2563_v59  ;;  %v2662_v2 = vor.u32 %v2965_v60, %v2659_v61  ;;  %v2938_v7 = vld [vmem:[%s4565_s1 + $0x3f4] sm:$0xf]  ;;  %v2125_v59 = vld [vmem:[%s4565_s1 + $0x98] sm:$0xf] }
  0x54   :  { %1451 = vmatpush.bf16.msra.mxu0 %v2086_v18  ;;  %v2974_v18 = vld [vmem:[%s4565_s1 + $0x514] sm:$0xf]  ;;  %v2832_v60 = vld [vmem:[%s4565_s1 + $0xa0] sm:$0xf0]  ;;  %v2221_v61 = vld [vmem:[%s4565_s1 + $0x158] sm:$0xf] }
  0x55   :  { %1464 = vmatpush.bf16.msra.mxu1 %v2182_v19  ;;  %v2695_v19 = vld [vmem:[%s4565_s1 + $0x51c] sm:$0xf0] }
  0x56   :  { %1477 = vmatpush.bf16.msra.mxu2 %v2278_v22  ;;  %v2998_v22 = vld [vmem:[%s4565_s1 + $0x5d4] sm:$0xf] }
  0x57   :  { %1490 = vmatpush.bf16.msra.mxu3 %v2374_v26  ;;  %v2698_v26 = vor.u32 %v2974_v18, %v2695_v19  ;;  %v2794_v30 = vor.u32 %v2998_v22, %v2791_v23  ;;  %v2443_v18 = vld [vmem:[%s4565_s1 + $0x324] sm:$0xf0]  ;;  %v2935_v19 = vld [vmem:[%s4565_s1 + $0x3dc] sm:$0xf] }
  0x58   :  { %1452 = vmatpush.bf16.msra.mxu0 %v2074_v32  ;;  %v2971_v32 = vld [vmem:[%s4565_s1 + $0x4fc] sm:$0xf]  ;;  %v2539_v23 = vld [vmem:[%s4565_s1 + $0x3e4] sm:$0xf0]  ;;  %v2446_v28 = vor.u32 %v2911_v17, %v2443_v18  ;;  %v2901_v17 = vld [vmem:[%s4565_s1 + $0x2c8] sm:$0xf0] }
  0x59   :  { %1465 = vmatpush.bf16.msra.mxu1 %v2170_v33  ;;  %v2683_v33 = vld [vmem:[%s4565_s1 + $0x504] sm:$0xf0]  ;;  %v2542_v31 = vor.u32 %v2935_v19, %v2539_v23 }
  0x5a   :  { %1478 = vmatpush.bf16.msra.mxu2 %v2266_v34  ;;  %v2995_v34 = vld [vmem:[%s4565_s1 + $0x5bc] sm:$0xf]  ;;  %v2101_v23 = vld [vmem:[%s4565_s1 + $0x68] sm:$0xf] }
  0x5b   :  { %1491 = vmatpush.bf16.msra.mxu3 %v2362_v39  ;;  %v2686_v39 = vor.u32 %v2971_v32, %v2683_v33  ;;  %v2782_v46 = vor.u32 %v2995_v34, %v2779_v35  ;;  %v2932_v33 = vld [vmem:[%s4565_s1 + $0x3c4] sm:$0xf]  ;;  %v2527_v34 = vld [vmem:[%s4565_s1 + $0x3cc] sm:$0xf0] }
  0x5c   :  { %1453 = vmatpush.bf16.msra.mxu0 %v2062_v48  ;;  %v2968_v48 = vld [vmem:[%s4565_s1 + $0x4e4] sm:$0xf] }
  0x5d   :  { %1466 = vmatpush.bf16.msra.mxu1 %v2158_v51  ;;  %v2767_v51 = vld [vmem:[%s4565_s1 + $0x5ac] sm:$0xf0]  ;;  %v2674_v54 = vor.u32 %v2968_v48, %v2671_v49  ;;  %v2956_v35 = vld [vmem:[%s4565_s1 + $0x484] sm:$0xf]  ;;  %v2859_v48 = vld [vmem:[%s4565_s1 + $0x178] sm:$0xf0] }
  0x5e   :  { %1479 = vmatpush.bf16.msra.mxu2 %v2254_v52  ;;  %v2482_v52 = vor.u32 %v2920_v40, %v2479_v43  ;;  %v2770_v58 = vor.u32 %v2992_v50, %v2767_v51  ;;  %v2719_v40 = vld [vmem:[%s4565_s1 + $0x54c] sm:$0xf0]  ;;  %v2883_v50 = vld [vmem:[%s4565_s1 + $0x238] sm:$0xf0]  ;;  %v2530_v51 = vor.u32 %v2932_v33, %v2527_v34 }
  0x5f   :  { %1492 = vmatpush.bf16.msra.mxu3 %v2350_v56  ;;  %v2467_v56 = vld [vmem:[%s4565_s1 + $0x354] sm:$0xf0]  ;;  %v2137_v43 = vld [vmem:[%s4565_s1 + $0xb0] sm:$0xf] }
  0x60   :  { %1454 = vmatpush.bf16.msra.mxu0 %v2050_v63  ;;  %v2755_v63 = vld [vmem:[%s4565_s1 + $0x594] sm:$0xf0]  ;;  %v2470_v0 = vor.u32 %v2917_v55, %v2467_v56  ;;  %v2329_v49 = vld [vmem:[%s4565_s1 + $0x230] sm:$0xf]  ;;  %v2138_v56 = vor.u32 %v2835_v45, %v2137_v43  ;;  %v2871_v45 = vld [vmem:[%s4565_s1 + $0x1d8] sm:$0xf0] }
  0x61   :  { %1467 = vmatpush.bf16.msra.mxu1 %v2146_v3  ;;  %v2914_v3 = vld [vmem:[%s4565_s1 + $0x334] sm:$0xf]  ;;  %v2758_v8 = vor.u32 %v2989_v62, %v2755_v63  ;;  %v2856_v63 = vld [vmem:[%s4565_s1 + $0x160] sm:$0xf0]  ;;  %v2281_v43 = vld [vmem:[%s4565_s1 + $0x1d0] sm:$0xf] }
  0x62   :  { %1480 = vmatpush.bf16.msra.mxu2 %v2242_v5  ;;  %v2455_v5 = vld [vmem:[%s4565_s1 + $0x33c] sm:$0xf0] }
  0x63   :  { %1493 = vmatpush.bf16.msra.mxu3 %v2338_v9  ;;  %1455 = vmatmul.bf16.vlgmr.msra.gmra.mxu0 %v3460_v20  ;;  %v2551_v9 = vld [vmem:[%s4565_s1 + $0x3fc] sm:$0xf0]  ;;  %v2458_v14 = vor.u32 %v2914_v3, %v2455_v5  ;;  %v2904_v3 = vld [vmem:[%s4565_s1 + $0x2e0] sm:$0xf0]  ;;  %v2126_v5 = vor.u32 %v2832_v60, %v2125_v59 }
  0x64   :  { %1499 = vmatpush.bf16.msrb.mxu0 %v2518_v10  ;;  %1468 = vmatmul.bf16.vlgmr.msra.gmra.mxu1 %v3463_v21  ;;  %v2962_v10 = vld [vmem:[%s4565_s1 + $0x4b4] sm:$0xf]  ;;  %v2554_v15 = vor.u32 %v2938_v7, %v2551_v9  ;;  %v2222_v7 = vor.u32 %v2856_v63, %v2221_v61  ;;  %v2113_v9 = vld [vmem:[%s4565_s1 + $0x80] sm:$0xf]  ;;  %v2892_v59 = vld [vmem:[%s4565_s1 + $0x280] sm:$0xf0] }
  0x65   :  { %1512 = vmatpush.bf16.msrb.mxu1 %v2614_v11  ;;  %1481 = vmatmul.bf16.vlgmr.msra.gmra.mxu2 %v3428_v4  ;;  %v2647_v11 = vld [vmem:[%s4565_s1 + $0x4bc] sm:$0xf0] }
  0x66   :  { %1525 = vmatpush.bf16.msrb.mxu2 %v2710_v12  ;;  %1494 = vmatmul.bf16.vlgmr.msra.gmra.mxu3 %v3433_v6  ;;  %v2986_v12 = vld [vmem:[%s4565_s1 + $0x574] sm:$0xf]  ;;  %v2065_v63 = vld [vmem:[%s4565_s1 + $0x20] sm:$0xf] }
  0x67   :  { %1538 = vmatpush.bf16.msrb.mxu3 %v2806_v16  ;;  %v2650_v16 = vor.u32 %v2962_v10, %v2647_v11  ;;  %v2746_v22 = vor.u32 %v2986_v12, %v2743_v13  ;;  %v2829_v10 = vld [vmem:[%s4565_s1 + $0x88] sm:$0xf0]  ;;  %v2209_v11 = vld [vmem:[%s4565_s1 + $0x140] sm:$0xf] }
  0x68   :  { %1500 = vmatpush.bf16.msrb.mxu0 %v2506_v24  ;;  %v2959_v24 = vld [vmem:[%s4565_s1 + $0x49c] sm:$0xf]  ;;  %v2853_v13 = vld [vmem:[%s4565_s1 + $0x148] sm:$0xf0]  ;;  %v2114_v18 = vor.u32 %v2829_v10, %v2113_v9 }
  0x69   :  { %1513 = vmatpush.bf16.msrb.mxu1 %v2602_v25  ;;  %v2635_v25 = vld [vmem:[%s4565_s1 + $0x4a4] sm:$0xf0]  ;;  %v2210_v19 = vor.u32 %v2853_v13, %v2209_v11  ;;  %v2889_v9 = vld [vmem:[%s4565_s1 + $0x268] sm:$0xf0] }
  0x6a   :  { %1526 = vmatpush.bf16.msrb.mxu2 %v2698_v26  ;;  %v2983_v26 = vld [vmem:[%s4565_s1 + $0x55c] sm:$0xf]  ;;  %v2638_v32 = vor.u32 %v2959_v24, %v2635_v25  ;;  %v2826_v24 = vld [vmem:[%s4565_s1 + $0x70] sm:$0xf0]  ;;  %v2197_v25 = vld [vmem:[%s4565_s1 + $0x128] sm:$0xf] }
  0x6b   :  { %1539 = vmatpush.bf16.msrb.mxu3 %v2794_v30  ;;  %v2431_v30 = vld [vmem:[%s4565_s1 + $0x30c] sm:$0xf0]  ;;  %v2053_v11 = vld [vmem:[%s4565_s1 + $0x8] sm:$0xf] }
  0x6c   :  { %1501 = vmatpush.bf16.msrb.mxu0 %v2494_v36  ;;  %v2734_v36 = vor.u32 %v2983_v26, %v2731_v27  ;;  %v2434_v47 = vor.u32 %v2908_v29, %v2431_v30  ;;  %v2850_v27 = vld [vmem:[%s4565_s1 + $0x130] sm:$0xf0]  ;;  %v2389_v30 = vld [vmem:[%s4565_s1 + $0x2a8] sm:$0xf] }
  0x6d   :  { %1514 = vmatpush.bf16.msrb.mxu1 %v2590_v37  ;;  %v2623_v37 = vld [vmem:[%s4565_s1 + $0x48c] sm:$0xf0]  ;;  %v2874_v29 = vld [vmem:[%s4565_s1 + $0x1f0] sm:$0xf0]  ;;  %v2198_v33 = vor.u32 %v2850_v27, %v2197_v25  ;;  %v2931_v25 = vld [vmem:[%s4565_s1 + $0x3b8] sm:$0xf0] }
  0x6e   :  { %1527 = vmatpush.bf16.msrb.mxu2 %v2686_v39  ;;  %v2980_v39 = vld [vmem:[%s4565_s1 + $0x544] sm:$0xf] }
  0x6f   :  { %1540 = vmatpush.bf16.msrb.mxu3 %v2782_v46  ;;  %v2233_v46 = vld [vmem:[%s4565_s1 + $0x170] sm:$0xf]  ;;  %v2722_v55 = vor.u32 %v2980_v39, %v2719_v40  ;;  %v2847_v40 = vld [vmem:[%s4565_s1 + $0x118] sm:$0xf0] }
  0x70   :  { %1502 = vmatpush.bf16.msrb.mxu0 %v2482_v52  ;;  %v2626_v52 = vor.u32 %v2956_v35, %v2623_v37  ;;  %v2234_v57 = vor.u32 %v2859_v48, %v2233_v46  ;;  %v2089_v35 = vld [vmem:[%s4565_s1 + $0x50] sm:$0xf] }
  0x71   :  { %1515 = vmatpush.bf16.msrb.mxu1 %v2578_v53  ;;  %v2425_v53 = vld [vmem:[%s4565_s1 + $0x2f0] sm:$0xf] }
  0x72   :  { %1528 = vmatpush.bf16.msrb.mxu2 %v2674_v54  ;;  %v2907_v54 = vld [vmem:[%s4565_s1 + $0x2f8] sm:$0xf0]  ;;  %v2185_v37 = vld [vmem:[%s4565_s1 + $0x110] sm:$0xf] }
  0x73   :  { %1541 = vmatpush.bf16.msrb.mxu3 %v2770_v58  ;;  %v2330_v58 = vor.u32 %v2883_v50, %v2329_v49  ;;  %v2426_v62 = vor.u32 %v2907_v54, %v2425_v53  ;;  %v2377_v46 = vld [vmem:[%s4565_s1 + $0x290] sm:$0xf]  ;;  %v2186_v49 = vor.u32 %v2847_v40, %v2185_v37  ;;  %v2282_v50 = vor.u32 %v2871_v45, %v2281_v43  ;;  %v2173_v53 = vld [vmem:[%s4565_s1 + $0xf8] sm:$0xf]  ;;  %v2928_v43 = vld [vmem:[%s4565_s1 + $0x3a0] sm:$0xf0] }
  0x74   :  { %1503 = vmatpush.bf16.msrb.mxu0 %v2470_v0  ;;  %v2317_v0 = vld [vmem:[%s4565_s1 + $0x218] sm:$0xf] }
  0x75   :  { %1516 = vmatpush.bf16.msrb.mxu1 %v2566_v1  ;;  %v2880_v1 = vld [vmem:[%s4565_s1 + $0x220] sm:$0xf0]  ;;  %v2509_v40 = vld [vmem:[%s4565_s1 + $0x398] sm:$0xf] }
  0x76   :  { %1529 = vmatpush.bf16.msrb.mxu2 %v2662_v2  ;;  %v2413_v2 = vld [vmem:[%s4565_s1 + $0x2d8] sm:$0xf] }
  0x77   :  { %1542 = vmatpush.bf16.msrb.mxu3 %v2758_v8  ;;  %v2318_v8 = vor.u32 %v2880_v1, %v2317_v0  ;;  %v2414_v12 = vor.u32 %v2904_v3, %v2413_v2  ;;  %v2817_v0 = vld [vmem:[%s4565_s1 + $0x28] sm:$0xf0]  ;;  %v2161_v1 = vld [vmem:[%s4565_s1 + $0xe0] sm:$0xf]  ;;  %v2605_v45 = vld [vmem:[%s4565_s1 + $0x458] sm:$0xf] }
  0x78   :  { %1504 = vmatpush.bf16.msrb.mxu0 %v2458_v14  ;;  %v2305_v14 = vld [vmem:[%s4565_s1 + $0x200] sm:$0xf]  ;;  %v2841_v3 = vld [vmem:[%s4565_s1 + $0xe8] sm:$0xf0]  ;;  %v2066_v10 = vor.u32 %v2817_v0, %v2065_v63 }
  0x79   :  { %1517 = vmatpush.bf16.msrb.mxu1 %v2554_v15  ;;  %v2877_v15 = vld [vmem:[%s4565_s1 + $0x208] sm:$0xf0]  ;;  %v2162_v13 = vor.u32 %v2841_v3, %v2161_v1  ;;  %v2922_v3 = vld [vmem:[%s4565_s1 + $0x370] sm:$0xf0] }
  0x7a   :  { %1530 = vmatpush.bf16.msrb.mxu2 %v2650_v16  ;;  %v2401_v16 = vld [vmem:[%s4565_s1 + $0x2c0] sm:$0xf] }
  0x7b   :  { %1543 = vmatpush.bf16.msrb.mxu3 %v2746_v22  ;;  %v2306_v22 = vor.u32 %v2877_v15, %v2305_v14  ;;  %v2402_v26 = vor.u32 %v2901_v17, %v2401_v16  ;;  %v2149_v15 = vld [vmem:[%s4565_s1 + $0xc8] sm:$0xf]  ;;  %v2838_v16 = vld [vmem:[%s4565_s1 + $0xd0] sm:$0xf0] }
  0x7c   :  { %1505 = vmatpush.bf16.msrb.mxu0 %v2446_v28  ;;  %v2293_v28 = vld [vmem:[%s4565_s1 + $0x1e8] sm:$0xf] }
  0x7d   :  { %1518 = vmatpush.bf16.msrb.mxu1 %v2542_v31  ;;  %v2898_v31 = vld [vmem:[%s4565_s1 + $0x2b0] sm:$0xf0]  ;;  %v2294_v34 = vor.u32 %v2874_v29, %v2293_v28  ;;  %v2245_v17 = vld [vmem:[%s4565_s1 + $0x188] sm:$0xf]  ;;  %v2955_v28 = vld [vmem:[%s4565_s1 + $0x478] sm:$0xf0] }
  0x7e   :  { %1531 = vmatpush.bf16.msrb.mxu2 %v2638_v32  ;;  %v2102_v32 = vor.u32 %v2826_v24, %v2101_v23  ;;  %v2390_v39 = vor.u32 %v2898_v31, %v2389_v30  ;;  %v2886_v23 = vld [vmem:[%s4565_s1 + $0x250] sm:$0xf0]  ;;  %v2521_v24 = vld [vmem:[%s4565_s1 + $0x3b0] sm:$0xf]  ;;  %v2979_v30 = vld [vmem:[%s4565_s1 + $0x538] sm:$0xf0]  ;;  %v2150_v31 = vor.u32 %v2838_v16, %v2149_v15 }
  0x7f   :  { %1544 = vmatpush.bf16.msrb.mxu3 %v2734_v36  ;;  %v2823_v36 = vld [vmem:[%s4565_s1 + $0x58] sm:$0xf0]  ;;  %v2713_v29 = vld [vmem:[%s4565_s1 + $0x530] sm:$0xf]  ;;  %v4277_v16 = vld [vmem:[%s4567_s2] sm:$0x7] }
  0x80   :  { %1506 = vmatpush.bf16.msrb.mxu0 %v2434_v47  ;;  %v2895_v47 = vld [vmem:[%s4565_s1 + $0x298] sm:$0xf0]  ;;  %v2090_v48 = vor.u32 %v2823_v36, %v2089_v35  ;;  %v2522_v36 = vor.u32 %v2931_v25, %v2521_v24  ;;  %v2569_v15 = vld [vmem:[%s4565_s1 + $0x410] sm:$0xf] }
  0x81   :  { %1519 = vmatpush.bf16.msrb.mxu1 %v2530_v51  ;;  %v2077_v51 = vld [vmem:[%s4565_s1 + $0x38] sm:$0xf]  ;;  %v2378_v54 = vor.u32 %v2895_v47, %v2377_v46  ;;  %v2952_v47 = vld [vmem:[%s4565_s1 + $0x460] sm:$0xf0]  ;;  %v2991_v24 = vld [vmem:[%s4565_s1 + $0x598] sm:$0xf0] }
  0x82   :  { %1532 = vmatpush.bf16.msrb.mxu2 %v2626_v52  ;;  %v2820_v52 = vld [vmem:[%s4565_s1 + $0x40] sm:$0xf0] }
  0x83   :  { %1545 = vmatpush.bf16.msrb.mxu3 %v2722_v55  ;;  %1507 = vmatmul.bf16.vlgmr.msrb.gmra.mxu0 %v3619_v41  ;;  %v2844_v55 = vld [vmem:[%s4565_s1 + $0x100] sm:$0xf0]  ;;  %v2078_v60 = vor.u32 %v2820_v52, %v2077_v51  ;;  %v2510_v52 = vor.u32 %v2928_v43, %v2509_v40 }
  0x84   :  { %1551 = vmatpush.bf16.msra.mxu0 %v2138_v56  ;;  %1520 = vmatmul.bf16.vlgmr.msrb.gmra.mxu1 %v3623_v44  ;;  %v2269_v56 = vld [vmem:[%s4565_s1 + $0x1b8] sm:$0xf]  ;;  %v2174_v61 = vor.u32 %v2844_v55, %v2173_v53  ;;  %v3000_v51 = vld [vmem:[%s4565_s1 + $0x5e0] sm:$0xf0]  ;;  %v2606_v53 = vor.u32 %v2952_v47, %v2605_v45  ;;  %v2497_v55 = vld [vmem:[%s4565_s1 + $0x380] sm:$0xf] }
  0x85   :  { %1564 = vmatpush.bf16.msra.mxu1 %v2234_v57  ;;  %1533 = vmatmul.bf16.vlgmr.msrb.gmra.mxu2 %v3611_v38  ;;  %v2868_v57 = vld [vmem:[%s4565_s1 + $0x1c0] sm:$0xf0] }
  0x86   :  { %1577 = vmatpush.bf16.msra.mxu2 %v2330_v58  ;;  %1546 = vmatmul.bf16.vlgmr.msrb.gmra.mxu3 %v3621_v42  ;;  %v2365_v58 = vld [vmem:[%s4565_s1 + $0x278] sm:$0xf] }
  0x87   :  { %1590 = vmatpush.bf16.msra.mxu3 %v2426_v62  ;;  %v2270_v62 = vor.u32 %v2868_v57, %v2269_v56  ;;  %v2366_v2 = vor.u32 %v2892_v59, %v2365_v58  ;;  %v2925_v56 = vld [vmem:[%s4565_s1 + $0x388] sm:$0xf0]  ;;  %v2593_v57 = vld [vmem:[%s4565_s1 + $0x440] sm:$0xf] }
  0x88   :  { %1552 = vmatpush.bf16.msra.mxu0 %v2126_v5  ;;  %v2257_v5 = vld [vmem:[%s4565_s1 + $0x1a0] sm:$0xf]  ;;  %v2949_v59 = vld [vmem:[%s4565_s1 + $0x448] sm:$0xf0]  ;;  %v2498_v63 = vor.u32 %v2925_v56, %v2497_v55 }
  0x89   :  { %1565 = vmatpush.bf16.msra.mxu1 %v2222_v7  ;;  %v2865_v7 = vld [vmem:[%s4565_s1 + $0x1a8] sm:$0xf0]  ;;  %v2594_v0 = vor.u32 %v2949_v59, %v2593_v57 }
  0x8a   :  { %1578 = vmatpush.bf16.msra.mxu2 %v2318_v8  ;;  %v2353_v8 = vld [vmem:[%s4565_s1 + $0x260] sm:$0xf]  ;;  %v2258_v14 = vor.u32 %v2865_v7, %v2257_v5  ;;  %v2677_v5 = vld [vmem:[%s4565_s1 + $0x4e8] sm:$0xf]  ;;  %v2970_v7 = vld [vmem:[%s4565_s1 + $0x4f0] sm:$0xf0] }
  0x8b   :  { %1591 = vmatpush.bf16.msra.mxu3 %v2414_v12  ;;  %v2814_v12 = vld [vmem:[%s4565_s1 + $0x10] sm:$0xf0]  ;;  %v2961_v55 = vld [vmem:[%s4565_s1 + $0x4a8] sm:$0xf0] }
  0x8c   :  { %1553 = vmatpush.bf16.msra.mxu0 %v2114_v18  ;;  %v2354_v18 = vor.u32 %v2889_v9, %v2353_v8  ;;  %v2054_v27 = vor.u32 %v2814_v12, %v2053_v11  ;;  %v2773_v8 = vld [vmem:[%s4565_s1 + $0x5a8] sm:$0xf]  ;;  %v2994_v9 = vld [vmem:[%s4565_s1 + $0x5b0] sm:$0xf0]  ;;  %v2473_v11 = vld [vmem:[%s4565_s1 + $0x350] sm:$0xf] }
  0x8d   :  { %1566 = vmatpush.bf16.msra.mxu1 %v2210_v19  ;;  %v2862_v19 = vld [vmem:[%s4565_s1 + $0x190] sm:$0xf0]  ;;  %v2985_v59 = vld [vmem:[%s4565_s1 + $0x568] sm:$0xf0] }
  0x8e   :  { %1579 = vmatpush.bf16.msra.mxu2 %v2306_v22  ;;  %v2341_v22 = vld [vmem:[%s4565_s1 + $0x248] sm:$0xf] }
  0x8f   :  { %1592 = vmatpush.bf16.msra.mxu3 %v2402_v26  ;;  %v2617_v26 = vld [vmem:[%s4565_s1 + $0x470] sm:$0xf]  ;;  %v2342_v35 = vor.u32 %v2886_v23, %v2341_v22  ;;  %v2967_v22 = vld [vmem:[%s4565_s1 + $0x4d8] sm:$0xf0] }
  0x90   :  { %1554 = vmatpush.bf16.msra.mxu0 %v2102_v32  ;;  %v2246_v32 = vor.u32 %v2862_v19, %v2245_v17  ;;  %v2618_v37 = vor.u32 %v2955_v28, %v2617_v26  ;;  %v2774_v17 = vor.u32 %v2994_v9, %v2773_v8  ;;  %v2665_v19 = vld [vmem:[%s4565_s1 + $0x4d0] sm:$0xf]  ;;  %v285_v26 = vperm.slane %v4277_v16, 0 }
  0x91   :  { %1567 = vmatpush.bf16.msra.mxu1 %v2198_v33  ;;  %v2809_v33 = vld [vmem:[%s4565_s1 + $0x5f0] sm:$0xf]  ;;  %v2666_v28 = vor.u32 %v2967_v22, %v2665_v19 }
  0x92   :  { %1580 = vmatpush.bf16.msra.mxu2 %v2294_v34  ;;  %v3003_v34 = vld [vmem:[%s4565_s1 + $0x5f8] sm:$0xf0]  ;;  %v2761_v23 = vld [vmem:[%s4565_s1 + $0x590] sm:$0xf] }
  0x93   :  { %1593 = vmatpush.bf16.msra.mxu3 %v2390_v39  ;;  %v2714_v39 = vor.u32 %v2979_v30, %v2713_v29  ;;  %v2810_v46 = vor.u32 %v3003_v34, %v2809_v33  ;;  %v2461_v29 = vld [vmem:[%s4565_s1 + $0x338] sm:$0xf]  ;;  %v2916_v30 = vld [vmem:[%s4565_s1 + $0x340] sm:$0xf0] }
  0x94   :  { %1555 = vmatpush.bf16.msra.mxu0 %v2090_v48  ;;  %v2701_v48 = vld [vmem:[%s4565_s1 + $0x518] sm:$0xf]  ;;  %v2940_v33 = vld [vmem:[%s4565_s1 + $0x400] sm:$0xf0]  ;;  %v2462_v40 = vor.u32 %v2916_v30, %v2461_v29 }
  0x95   :  { %1568 = vmatpush.bf16.msra.mxu1 %v2186_v49  ;;  %v2976_v49 = vld [vmem:[%s4565_s1 + $0x520] sm:$0xf0]  ;;  %v2653_v34 = vld [vmem:[%s4565_s1 + $0x4b8] sm:$0xf] }
  0x96   :  { %1581 = vmatpush.bf16.msra.mxu2 %v2282_v50  ;;  %v2797_v50 = vld [vmem:[%s4565_s1 + $0x5d8] sm:$0xf] }
  0x97   :  { %1594 = vmatpush.bf16.msra.mxu3 %v2378_v54  ;;  %v2702_v54 = vor.u32 %v2976_v49, %v2701_v48  ;;  %v2798_v58 = vor.u32 %v3000_v51, %v2797_v50  ;;  %v2449_v48 = vld [vmem:[%s4565_s1 + $0x320] sm:$0xf]  ;;  %v2913_v49 = vld [vmem:[%s4565_s1 + $0x328] sm:$0xf0] }
  0x98   :  { %1556 = vmatpush.bf16.msra.mxu0 %v2078_v60  ;;  %v2689_v60 = vld [vmem:[%s4565_s1 + $0x500] sm:$0xf] }
  0x99   :  { %1569 = vmatpush.bf16.msra.mxu1 %v2174_v61  ;;  %v2973_v61 = vld [vmem:[%s4565_s1 + $0x508] sm:$0xf0]  ;;  %v2545_v50 = vld [vmem:[%s4565_s1 + $0x3e0] sm:$0xf] }
  0x9a   :  { %1582 = vmatpush.bf16.msra.mxu2 %v2270_v62  ;;  %v2785_v62 = vld [vmem:[%s4565_s1 + $0x5c0] sm:$0xf]  ;;  %v2690_v1 = vor.u32 %v2973_v61, %v2689_v60  ;;  %v2450_v60 = vor.u32 %v2913_v49, %v2449_v48 }
  0x9b   :  { %1595 = vmatpush.bf16.msra.mxu3 %v2366_v2  ;;  %v2485_v2 = vld [vmem:[%s4565_s1 + $0x368] sm:$0xf] }
  0x9c   :  { %1557 = vmatpush.bf16.msra.mxu0 %v2066_v10  ;;  %v2486_v10 = vor.u32 %v2922_v3, %v2485_v2  ;;  %v2934_v3 = vld [vmem:[%s4565_s1 + $0x3d0] sm:$0xf0] }
  0x9d   :  { %1570 = vmatpush.bf16.msra.mxu1 %v2162_v13  ;;  %v2678_v13 = vor.u32 %v2970_v7, %v2677_v5  ;;  %v2725_v5 = vld [vmem:[%s4565_s1 + $0x548] sm:$0xf]  ;;  %v2982_v7 = vld [vmem:[%s4565_s1 + $0x550] sm:$0xf0] }
  0x9e   :  { %1583 = vmatpush.bf16.msra.mxu2 %v2258_v14  ;;  %v2919_v14 = vld [vmem:[%s4565_s1 + $0x358] sm:$0xf0] }
  0x9f   :  { %1596 = vmatpush.bf16.msra.mxu3 %v2354_v18  ;;  %v2943_v18 = vld [vmem:[%s4565_s1 + $0x418] sm:$0xf0]  ;;  %v2474_v25 = vor.u32 %v2919_v14, %v2473_v11  ;;  %v2726_v14 = vor.u32 %v2982_v7, %v2725_v5 }
  0xa0   :  { %1558 = vmatpush.bf16.msra.mxu0 %v2054_v27  ;;  %v2570_v27 = vor.u32 %v2943_v18, %v2569_v15 }
  0xa1   :  { %1571 = vmatpush.bf16.msra.mxu1 %v2150_v31  ;;  %v2557_v31 = vld [vmem:[%s4565_s1 + $0x3f8] sm:$0xf] }
  0xa2   :  { %1584 = vmatpush.bf16.msra.mxu2 %v2246_v32  ;;  %v2762_v32 = vor.u32 %v2991_v24, %v2761_v23 }
  0xa3   :  { %1597 = vmatpush.bf16.msra.mxu3 %v2342_v35  ;;  %1559 = vmatmul.bf16.vlgmr.msra.gmra.mxu0 %v3460_v20  ;;  %v2964_v35 = vld [vmem:[%s4565_s1 + $0x4c0] sm:$0xf0] }
  0xa4   :  { %1603 = vmatpush.bf16.msrb.mxu0 %v2522_v36  ;;  %1572 = vmatmul.bf16.vlgmr.msra.gmra.mxu1 %v3463_v21  ;;  %v2946_v21 = vld [vmem:[%s4565_s1 + $0x430] sm:$0xf0]  ;;  %v2749_v36 = vld [vmem:[%s4565_s1 + $0x578] sm:$0xf]  ;;  %v2654_v47 = vor.u32 %v2964_v35, %v2653_v34 }
  0xa5   :  { %1616 = vmatpush.bf16.msrb.mxu1 %v2618_v37  ;;  %1585 = vmatmul.bf16.vlgmr.msra.gmra.mxu2 %v3428_v4  ;;  %v2997_v4 = vld [vmem:[%s4565_s1 + $0x5c8] sm:$0xf0]  ;;  %v2988_v37 = vld [vmem:[%s4565_s1 + $0x580] sm:$0xf0]  ;;  %v1365_v45 = vpop.f32.mrf.mxu1 }
  0xa6   :  { %1629 = vmatpush.bf16.msrb.mxu2 %v2714_v39  ;;  %1598 = vmatmul.bf16.vlgmr.msra.gmra.mxu3 %v3433_v6  ;;  %v2581_v6 = vld [vmem:[%s4565_s1 + $0x428] sm:$0xf]  ;;  %v2786_v20 = vor.u32 %v2997_v4, %v2785_v62  ;;  %v1352_v39 = vpop.f32.mrf.mxu0 }
  0xa7   :  { %1642 = vmatpush.bf16.msrb.mxu3 %v2810_v46  ;;  %v2582_v12 = vor.u32 %v2946_v21, %v2581_v6  ;;  %v1353_v43 = vadd.f32 %v1352_v39, %v285_v26  ;;  %v2558_v46 = vor.u32 %v2940_v33, %v2557_v31  ;;  %v2629_v6 = vld [vmem:[%s4565_s1 + $0x488] sm:$0xf] }
  0xa8   :  { %1604 = vmatpush.bf16.msrb.mxu0 %v2510_v52  ;;  %v1378_v51 = vpop.f32.mrf.mxu2  ;;  %v2750_v52 = vor.u32 %v2988_v37, %v2749_v36 }
  0xa9   :  { %1617 = vmatpush.bf16.msrb.mxu1 %v2606_v53  ;;  %v2937_v53 = vld [vmem:[%s4565_s1 + $0x3e8] sm:$0xf0]  ;;  %v1366_v56 = vadd.f32 %v1365_v45, %v1353_v43  ;;  %v1391_v57 = vpop.f32.mrf.mxu3 }
  0xaa   :  { %1630 = vmatpush.bf16.msrb.mxu2 %v2702_v54  ;;  %v2641_v54 = vld [vmem:[%s4565_s1 + $0x4a0] sm:$0xf]  ;;  %v2546_v62 = vor.u32 %v2937_v53, %v2545_v50 }
  0xab   :  { %1643 = vmatpush.bf16.msrb.mxu3 %v2798_v58  ;;  %v2737_v58 = vld [vmem:[%s4565_s1 + $0x560] sm:$0xf]  ;;  %v1379_v61 = vadd.f32 %v1378_v51, %v1366_v56  ;;  %v2642_v4 = vor.u32 %v2961_v55, %v2641_v54 }
  0xac   :  { %1605 = vmatpush.bf16.msrb.mxu0 %v2498_v63  ;;  %v2437_v63 = vld [vmem:[%s4565_s1 + $0x308] sm:$0xf]  ;;  %v2738_v2 = vor.u32 %v2985_v59, %v2737_v58 }
  0xad   :  { %1618 = vmatpush.bf16.msrb.mxu1 %v2594_v0  ;;  %v2910_v0 = vld [vmem:[%s4565_s1 + $0x310] sm:$0xf0]  ;;  %v1392_v21 = vadd.f32 %v1391_v57, %v1379_v61 }
  0xae   :  { %1631 = vmatpush.bf16.msrb.mxu2 %v2690_v1  ;;  %v2533_v1 = vld [vmem:[%s4565_s1 + $0x3c8] sm:$0xf]  ;;  %v1354_v8 = vpop.f32.mrf.mxu0  ;;  %v2438_v9 = vor.u32 %v2910_v0, %v2437_v63 }
  0xaf   :  { %1644 = vmatpush.bf16.msrb.mxu3 %v2786_v20  ;;  %v2958_v20 = vld [vmem:[%s4565_s1 + $0x490] sm:$0xf0]  ;;  %v2534_v11 = vor.u32 %v2934_v3, %v2533_v1  ;;  %s3090_s1 = smov 96  }
  0xb0   :  { %1606 = vmatpush.bf16.msrb.mxu0 %v2486_v10  ;;  %v1367_v10 = vpop.f32.mrf.mxu1 }
  0xb1   :  { %1619 = vmatpush.bf16.msrb.mxu1 %v2582_v12  ;;  %v2630_v12 = vor.u32 %v2958_v20, %v2629_v6  ;;  %v1393_v15 = vpop.f32.mrf.mxu3 }
  0xb2   :  { %1632 = vmatpush.bf16.msrb.mxu2 %v2678_v13  ;;  %v1380_v13 = vpop.f32.mrf.mxu2  ;;  %v4394_v15 = vld [vmem:[%s4568_s3] sm:$0xff] }
  0xb3   :  { %1645 = vmatpush.bf16.msrb.mxu3 %v2774_v17  ;;  %vm1714_vm0 = vcmp.eq.s32.totalorder %v4394_v15, 1  ;;  %vm1699_vm1 = vcmp.eq.s32.totalorder %v4394_v15, 0  ;;  %vm1728_vm2 = vcmp.eq.s32.totalorder %v4394_v15, 2  ;;  %vm1742_vm3 = vcmp.eq.s32.totalorder %v4394_v15, 3 }
  0xb4   :  { %1607 = vmatpush.bf16.msrb.mxu0 %v2474_v25  ;;  %vm1749_vm4 = vcmp.eq.s32.totalorder %v4394_v15, 4  ;;  %vm1760_vm5 = vcmp.eq.s32.totalorder %v4394_v15, 5  ;;  %vm1771_vm6 = vcmp.eq.s32.totalorder %v4394_v15, 6  ;;  %vm1789_vm8 = vcmp.gt.s32.totalorder %v4394_v15, 0 }
  0xb5   :  { %1620 = vmatpush.bf16.msrb.mxu1 %v2570_v27  ;;  %vm1782_vm9 = vcmp.eq.s32.totalorder %v4394_v15, 7  ;;  %v3097_v15 = vmov 3  }
  0xb6   :  { %1633 = vmatpush.bf16.msrb.mxu2 %v2666_v28 }
  0xb7   :  { %1646 = vmatpush.bf16.msrb.mxu3 %v2762_v32 }
  0xb8   :  { %1608 = vmatpush.bf16.msrb.mxu0 %v2462_v40 }
  0xb9   :  { %1621 = vmatpush.bf16.msrb.mxu1 %v2558_v46 }
  0xba   :  { %1634 = vmatpush.bf16.msrb.mxu2 %v2654_v47 }
  0xbb   :  { %1647 = vmatpush.bf16.msrb.mxu3 %v2750_v52 }
  0xbc   :  { %1609 = vmatpush.bf16.msrb.mxu0 %v2450_v60 }
  0xbd   :  { %1622 = vmatpush.bf16.msrb.mxu1 %v2546_v62  ;;  %v287_v62 = vperm.slane %v4277_v16, 2 }
  0xbe   :  { %1635 = vmatpush.bf16.msrb.mxu2 %v2642_v4 }
  0xbf   :  { %1648 = vmatpush.bf16.msrb.mxu3 %v2738_v2 }
  0xc0   :  { %1610 = vmatpush.bf16.msrb.mxu0 %v2438_v9  ;;  %v1404_v17 = vpop.f32.mrf.mxu0 }
  0xc1   :  { %1623 = vmatpush.bf16.msrb.mxu1 %v2534_v11  ;;  %v1405_v18 = vadd.f32 %v1404_v17, %v1392_v21  ;;  %v1417_v19 = vpop.f32.mrf.mxu1 }
  0xc2   :  { %1636 = vmatpush.bf16.msrb.mxu2 %v2630_v12 }
  0xc3   :  { %1649 = vmatpush.bf16.msrb.mxu3 %v2726_v14  ;;  %1611 = vmatmul.bf16.vlgmr.msrb.gmra.mxu0 %v3619_v41  ;;  %v1418_v22 = vadd.f32 %v1417_v19, %v1405_v18 }
  0xc4   :  { %1624 = vmatmul.bf16.vlgmr.msrb.gmra.mxu1 %v3623_v44 }
  0xc5   :  { %1637 = vmatmul.bf16.vlgmr.msrb.gmra.mxu2 %v3611_v38 }
  0xc6   :  { %1650 = vmatmul.bf16.vlgmr.msrb.gmra.mxu3 %v3621_v42  ;;  %v286_v42 = vperm.slane %v4277_v16, 1 }
  0xc8   :  { %v1430_v23 = vpop.f32.mrf.mxu2  ;;  %v1406_v27 = vpop.f32.mrf.mxu0 }
  0xc9   :  { %v1431_v24 = vadd.f32 %v1430_v23, %v1418_v22  ;;  %v1443_v25 = vpop.f32.mrf.mxu3  ;;  %v1419_v28 = vpop.f32.mrf.mxu1 }
  0xcb   :  { %v4371_v26 = vadd.f32 %v1443_v25, %v1431_v24 }
  0xd0   :  { %v1432_v29 = vpop.f32.mrf.mxu2 }
  0xd1   :  { %v1445_v30 = vpop.f32.mrf.mxu3 }
  0xe0   :  { %v1456_v41 = vpop.f32.mrf.mxu0 }
  0xe1   :  { %v1469_v31 = vpop.f32.mrf.mxu1  ;;  %v1457_v36 = vadd.f32 %v1456_v41, %v286_v42 }
  0xe3   :  { %v1470_v37 = vadd.f32 %v1469_v31, %v1457_v36 }
  0xe8   :  { %v1482_v44 = vpop.f32.mrf.mxu2  ;;  %v1458_v38 = vpop.f32.mrf.mxu0 }
  0xe9   :  { %v1495_v32 = vpop.f32.mrf.mxu3  ;;  %v1471_v33 = vpop.f32.mrf.mxu1  ;;  %v1483_v39 = vadd.f32 %v1482_v44, %v1470_v37 }
  0xeb   :  { %v1496_v40 = vadd.f32 %v1495_v32, %v1483_v39 }
  0xf0   :  { %v1484_v34 = vpop.f32.mrf.mxu2 }
  0xf1   :  { %v1497_v35 = vpop.f32.mrf.mxu3 }
 0x100   :  { %v1508_v43 = vpop.f32.mrf.mxu0 }
 0x101   :  { %v1509_v45 = vadd.f32 %v1508_v43, %v1496_v40  ;;  %v1521_v46 = vpop.f32.mrf.mxu1 }
 0x103   :  { %v1522_v47 = vadd.f32 %v1521_v46, %v1509_v45  ;;  %v1655_v45 = vld [vmem:[%s4569_s5] sm:$0xff] }
 0x104   :  { %v1656_v46 = vsub.f32 %v4371_v26, %v1655_v45 }
 0x108   :  { %v1534_v48 = vpop.f32.mrf.mxu2  ;;  %v1510_v52 = vpop.f32.mrf.mxu0 }
 0x109   :  { %v1535_v49 = vadd.f32 %v1534_v48, %v1522_v47  ;;  %v1547_v50 = vpop.f32.mrf.mxu3  ;;  %v1523_v53 = vpop.f32.mrf.mxu1  ;;  %v1659_v47 = vmul.f32 0.5, %v1656_v46  ;;  %v1657_v48 = vand.u32 2147483647, %v1656_v46 }
 0x10a   :  { %v1663_v53 = vld [vmem:[%s4570_s4] sm:$0xff] }
 0x10b   :  { %v4374_v51 = vadd.f32 %v1547_v50, %v1535_v49  ;;  %v1660_v49 = vmul.f32 %v1659_v47, %v1656_v46  ;;  %v2811_v50 = vadd.f32 -0.5, %v1657_v48  ;;  %vm1658_vm7 = vcmp.lt.f32.partialorder %v1657_v48, 1.0 }
 0x10c   :  { %v3099_v47 = vmov 17   ;;  %v3102_v48 = vmov 22  }
 0x10d   :  { %1669 = vrot.lane.b32.xlu0 %v4374_v51, %s3090_s1  ;;  %1677 = vrot.lane.b32.xlu1 %v4374_v51, %s3091_s8  ;;  %v1700_v18 = vsel %vm1699_vm1, %v4374_v51, 0.0  ;;  %v1662_v52 = vsel %vm1658_vm7, %v1660_v49, %v2811_v50  ;;  %v3103_v49 = vmov 8   ;;  %v3104_v50 = vmov 7  }
 0x110   :  { %v1536_v54 = vpop.f32.mrf.mxu2 }
 0x111   :  { %v1549_v55 = vpop.f32.mrf.mxu3  ;;  %v1664_v54 = vmul.f32 %v1663_v53, %v1662_v52  ;;  %v3105_v52 = vmov 27   ;;  %v3106_v53 = vmov 10  }
 0x115   :  { %1673 = vrot.lane.b32.xlu0 %v4374_v51, %s3092_s9 }
 0x120   :  { %v1560_v56 = vpop.f32.mrf.mxu0 }
 0x121   :  { %v1573_v57 = vpop.f32.mrf.mxu1  ;;  %v1561_v0 = vadd.f32 %v1560_v56, %v287_v62 }
 0x123   :  { %v1574_v1 = vadd.f32 %v1573_v57, %v1561_v0 }
 0x128   :  { %v1586_v58 = vpop.f32.mrf.mxu2  ;;  %v1562_v60 = vpop.f32.mrf.mxu0 }
 0x129   :  { %v1599_v59 = vpop.f32.mrf.mxu3  ;;  %v1575_v61 = vpop.f32.mrf.mxu1  ;;  %v1587_v2 = vadd.f32 %v1586_v58, %v1574_v1 }
 0x12b   :  { %v1600_v3 = vadd.f32 %v1599_v59, %v1587_v2 }
 0x130   :  { %v1588_v4 = vpop.f32.mrf.mxu2 }
 0x131   :  { %v1601_v63 = vpop.f32.mrf.mxu3 }
 0x140   :  { %v1612_v6 = vpop.f32.mrf.mxu0 }
 0x141   :  { %v1625_v20 = vpop.f32.mrf.mxu1  ;;  %v1613_v21 = vadd.f32 %v1612_v6, %v1600_v3 }
 0x143   :  { %v1626_v5 = vadd.f32 %v1625_v20, %v1613_v21 }
 0x148   :  { %v1638_v7 = vpop.f32.mrf.mxu2  ;;  %v1614_v10 = vpop.f32.mrf.mxu0 }
 0x149   :  { %v1639_v8 = vadd.f32 %v1638_v7, %v1626_v5  ;;  %v1651_v9 = vpop.f32.mrf.mxu3  ;;  %v1627_v11 = vpop.f32.mrf.mxu1 }
 0x14b   :  { %v4383_v12 = vadd.f32 %v1651_v9, %v1639_v8 }
 0x14d   :  { %1687 = vrot.lane.b32.xlu2 %v4383_v12, %s3092_s9  ;;  %1683 = vrot.lane.b32.xlu1 %v4383_v12, %s3090_s1  ;;  %v1750_v44 = vsel %vm1749_vm4, %v4383_v12, 0.0 }
 0x150   :  { %v1640_v16 = vpop.f32.mrf.mxu2 }
 0x151   :  { %v1653_v13 = vpop.f32.mrf.mxu3 }
 0x155   :  { %1691 = vrot.lane.b32.xlu2 %v4383_v12, %s3091_s8 }
 0x17f   :  { %v1670_v14 = vpop.permute.xlu0 %1669  ;;  %v1678_v22 = vpop.permute.xlu1 %1677 }
 0x180   :  { %v1715_v17 = vsel %vm1714_vm0, %v1670_v14, 0.0  ;;  %v1743_v27 = vsel %vm1742_vm3, %v1678_v22, 0.0  ;;  %v1672_v29 = vmax.f32 %v4374_v51, %v1670_v14 }
 0x181   :  { %v1716_v19 = vadd.f32 %v1715_v17, %v1700_v18 }
 0x187   :  { %v1674_v23 = vpop.permute.xlu0 %1673 }
 0x188   :  { %v1729_v24 = vsel %vm1728_vm2, %v1674_v23, 0.0  ;;  %v1676_v30 = vmax.f32 %v1672_v29, %v1674_v23  ;;  %v3095_v23 = vmov 0  }
 0x189   :  { %v1730_v25 = vadd.f32 %v1729_v24, %v1716_v19  ;;  %v3093_v19 = vmov 6   ;;  %3040 = vset.pattern.permute.xlu1 %v3095_v23 }
 0x18a   :  { %v1680_v31 = vmax.f32 %v1676_v30, %v1678_v22  ;;  %3046 = vset.pattern.permute.xlu0 %v3093_v19  ;;  %v3094_v22 = vmov 1  }
 0x18b   :  { %v1744_v28 = vadd.f32 %v1743_v27, %v1730_v25  ;;  %3041 = vset.pattern.permute.xlu2 %v3094_v22 }
 0x18c   :  { %v1681_v32 = vmax.f32 %v1680_v31, %v4383_v12 }
 0x18d   :  { %v1751_v33 = vadd.f32 %v1750_v44, %v1744_v28 }
 0x1a7   :  { %v1688_v41 = vpop.permute.xlu2 %1687 }
 0x1a8   :  { %v1772_v36 = vsel %vm1771_vm6, %v1688_v41, 0.0 }
 0x1af   :  { %v4407_v39 = vpop.permute.xlu2 %1691 }
 0x1bf   :  { %v1684_v38 = vpop.permute.xlu1 %1683 }
 0x1c0   :  { %v1686_v42 = vmax.f32 %v1681_v32, %v1684_v38  ;;  %v1761_v34 = vsel %vm1760_vm5, %v1684_v38, 0.0  ;;  %v3096_v38 = vmov 0.0  }
 0x1c1   :  { %v1762_v35 = vadd.f32 %v1761_v34, %v1751_v33  ;;  %v4446_v33 = vsel %vm1789_vm8, 1.0, %v3096_v38  ;;  %v1783_v34 = vsel %vm1782_vm9, %v4407_v39, 0.0 }
 0x1c2   :  { %v1690_v37 = vmax.f32 %v1686_v42, %v1688_v41 }
 0x1c3   :  { %v4409_v40 = vadd.f32 %v1772_v36, %v1762_v35  ;;  %v1791_v35 = vsub.f32 1.0, %v4446_v33 }
 0x1c4   :  { %v4412_v43 = vmax.f32 %v1690_v37, %v4407_v39  ;;  %v3098_v39 = vmov 2  }
 0x1c5   :  { %v1784_v36 = vadd.f32 %v1783_v34, %v4409_v40  ;;  %v3100_v40 = vmov 5  }
 0x1c6   :  { %1731 = vrot.lane.b32.xlu2 %v4412_v43, %s3090_s1  ;;  %1717 = vrot.lane.b32.xlu1 %v4412_v43, %s3092_s9  ;;  %v1695_v9 = vsub.f32 %v4374_v51, %v4412_v43  ;;  %v1745_v11 = vsub.f32 %v4383_v12, %v4412_v43 }
 0x1c7   :  { %1703 = vrot.lane.b32.xlu0 %v4412_v43, %s3091_s8 }
 0x1c8   :  { %v1696_v10 = vmul.f32 1.442695, %v1695_v9  ;;  %v1746_v14 = vmul.f32 1.442695, %v1745_v11  ;;  %v2019_v11 = vsel %vm2018_vm10, %v4446_v33, 0.0 }
 0x1f1   :  { %1665 = vadd.xlane.f32.xlu0 %v1664_v54  ;;  %v3107_v54 = vmov 9  }
 0x220   :  { %v1732_v26 = vpop.permute.xlu2 %1731 }
 0x221   :  { %v1734_v62 = vsub.f32 %v4374_v51, %v1732_v26  ;;  %v1774_v2 = vsub.f32 %v4383_v12, %v1732_v26  ;;  %v3113_v26 = vmov 16  }
 0x223   :  { %v1735_v0 = vmul.f32 1.442695, %v1734_v62  ;;  %v1775_v6 = vmul.f32 1.442695, %v1774_v2  ;;  %v3116_v62 = vmov 18   ;;  %v3121_v2 = vmov 26  }
 0x238   :  { %v1718_v55 = vpop.permute.xlu1 %1717 }
 0x239   :  { %v1720_v56 = vsub.f32 %v4374_v51, %v1718_v55  ;;  %v1704_v57 = vpop.permute.xlu0 %1703  ;;  %v1763_v3 = vsub.f32 %v4383_v12, %v1718_v55  ;;  %v3108_v55 = vmov 31  }
 0x23a   :  { %v1706_v58 = vsub.f32 %v4374_v51, %v1704_v57  ;;  %v1752_v61 = vsub.f32 %v4383_v12, %v1704_v57  ;;  %v3110_v57 = vmov 11  }
 0x23b   :  { %v1721_v59 = vmul.f32 1.442695, %v1720_v56  ;;  %v1764_v21 = vmul.f32 1.442695, %v1763_v3  ;;  %v3109_v56 = vmov 12   ;;  %v3122_v3 = vmov 25  }
 0x23c   :  { %v1707_v60 = vmul.f32 1.442695, %v1706_v58  ;;  %v1753_v4 = vmul.f32 1.442695, %v1752_v61  ;;  %v3111_v58 = vmov 14   ;;  %v3115_v61 = vmov 19  }
 0x23d   :  { %3072 = vpow2.f32 %v1721_v59  ;;  %v3112_v59 = vmov 13  }
 0x23e   :  { %3074 = vpow2.f32 %v1707_v60  ;;  %v3114_v60 = vmov 15  }
 0x23f   :  { %3076 = vpow2.f32 %v1753_v4  ;;  %v3117_v4 = vmov 21  }
 0x240   :  { %3078 = vpow2.f32 %v1735_v0  ;;  %v3119_v0 = vmov 24  }
 0x241   :  { %3080 = vpow2.f32 %v1775_v6  ;;  %v3123_v6 = vmov 29  }
 0x242   :  { %3082 = vpow2.f32 %v1764_v21  ;;  %v3125_v21 = vmov 30  }
 0x243   :  { %v3073_v63 = vpop.eup %3072  ;;  %3084 = vpow2.f32 %v1696_v10 }
 0x244   :  { %1724 = vrot.lane.b32.xlu2 %v3073_v63, %s3092_s9  ;;  %v3075_v1 = vpop.eup %3074  ;;  %3086 = vpow2.f32 %v1746_v14  ;;  %v3118_v63 = vmov 20  }
 0x245   :  { %1710 = vrot.lane.b32.xlu1 %v3075_v1, %s3090_s1  ;;  %v3077_v20 = vpop.eup %3076  ;;  %v3120_v1 = vmov 23  }
 0x246   :  { %v3079_v5 = vpop.eup %3078 }
 0x247   :  { %v3081_v7 = vpop.eup %3080 }
 0x248   :  { %v3083_v8 = vpop.eup %3082 }
 0x249   :  { %v3085_v17 = vpop.eup %3084 }
 0x24a   :  { %v3087_v28 = vpop.eup %3086 }
 0x24c   :  { %1756 = vrot.lane.b32.xlu2 %v3077_v20, %s3090_s1  ;;  %v3124_v20 = vmov 28  }
 0x24d   :  { %1738 = vrot.lane.b32.xlu1 %v3079_v5, %s3091_s8 }
 0x254   :  { %1778 = vrot.lane.b32.xlu2 %v3081_v7, %s3091_s8 }
 0x255   :  { %1767 = vrot.lane.b32.xlu1 %v3083_v8, %s3092_s9 }
 0x264   :  { %v4497_v23 = vpop.xlane.xlu0 %1665 }
 0x29e   :  { %v1725_v16 = vpop.permute.xlu2 %1724 }
 0x2a6   :  { %v1757_v25 = vpop.permute.xlu2 %1756 }
 0x2ae   :  { %v1779_v31 = vpop.permute.xlu2 %1778 }
 0x2b7   :  { %v1711_v13 = vpop.permute.xlu1 %1710 }
 0x2b8   :  { %v1713_v18 = vadd.f32 %v3085_v17, %v1711_v13 }
 0x2ba   :  { %v1727_v24 = vadd.f32 %v1725_v16, %v1713_v18 }
 0x2bf   :  { %v1739_v51 = vpop.permute.xlu1 %1738 }
 0x2c0   :  { %v1741_v27 = vadd.f32 %v1739_v51, %v1727_v24 }
 0x2c2   :  { %v1748_v29 = vadd.f32 %v3087_v28, %v1741_v27 }
 0x2c4   :  { %v1759_v30 = vadd.f32 %v1757_v25, %v1748_v29 }
 0x2c7   :  { %v1768_v12 = vpop.permute.xlu1 %1767 }
 0x2c8   :  { %v1770_v41 = vadd.f32 %v1768_v12, %v1759_v30 }
 0x2ca   :  { %v1781_v44 = vadd.f32 %v1779_v31, %v1770_v41 }
 0x2cc   :  { %3088 = vlog2.f32 %v1781_v44 }
 0x2d2   :  { %v3089_v32 = vpop.eup %3088 }
 0x2d3   :  { %v1786_v42 = vmul.f32 0.6931472, %v3089_v32 }
 0x2d5   :  { %v1787_v37 = vadd.f32 %v1786_v42, %v4412_v43  ;;  %v3101_v43 = vmov 4  }
 0x2d7   :  { %v4452_v45 = vsub.f32 %v1787_v37, %v1784_v36 }
 0x2d9   :  { %v4455_v46 = vmul.f32 %v1791_v35, %v4452_v45 }
 0x2db   :  { %1802 = vperm.xlu2 %3041, %v4455_v46   ;;  %1795 = vperm.xlu1 %3040, %v4455_v46  }
 0x2dc   :  { %1837 = vperm.xlu0 %3046, %v4455_v46  }
 0x2e3   :  { %3043 = vset.pattern.permute.xlu2 %v3097_v15  ;;  %3042 = vset.pattern.permute.xlu1 %v3098_v39 }
 0x2e4   :  { %3057 = vset.pattern.permute.xlu0 %v3099_v47  ;;  %1816 = vperm.xlu2 %3043, %v4455_v46  }
 0x2e5   :  { %1809 = vperm.xlu1 %3042, %v4455_v46   ;;  %1914 = vperm.xlu0 %3057, %v4455_v46  }
 0x2ec   :  { %3045 = vset.pattern.permute.xlu2 %v3100_v40 }
 0x2ed   :  { %3044 = vset.pattern.permute.xlu1 %v3101_v43  ;;  %3062 = vset.pattern.permute.xlu0 %v3102_v48 }
 0x2ee   :  { %1830 = vperm.xlu2 %3045, %v4455_v46   ;;  %1823 = vperm.xlu1 %3044, %v4455_v46  }
 0x2ef   :  { %1949 = vperm.xlu0 %3062, %v4455_v46  }
 0x2f6   :  { %3048 = vset.pattern.permute.xlu2 %v3103_v49  ;;  %3047 = vset.pattern.permute.xlu1 %v3104_v50 }
 0x2f7   :  { %3067 = vset.pattern.permute.xlu0 %v3105_v52  ;;  %1851 = vperm.xlu2 %3048, %v4455_v46  }
 0x2f8   :  { %1844 = vperm.xlu1 %3047, %v4455_v46   ;;  %1984 = vperm.xlu0 %3067, %v4455_v46  }
 0x2ff   :  { %3050 = vset.pattern.permute.xlu2 %v3106_v53 }
 0x300   :  { %3049 = vset.pattern.permute.xlu1 %v3107_v54  ;;  %3071 = vset.pattern.permute.xlu0 %v3108_v55 }
 0x301   :  { %1865 = vperm.xlu2 %3050, %v4455_v46   ;;  %1858 = vperm.xlu1 %3049, %v4455_v46  }
 0x302   :  { %2012 = vperm.xlu0 %3071, %v4455_v46  }
 0x309   :  { %3052 = vset.pattern.permute.xlu2 %v3109_v56  ;;  %3051 = vset.pattern.permute.xlu1 %v3110_v57 }
 0x30a   :  { %1879 = vperm.xlu2 %3052, %v4455_v46   ;;  %1872 = vperm.xlu1 %3051, %v4455_v46  }
 0x312   :  { %3054 = vset.pattern.permute.xlu2 %v3111_v58  ;;  %3053 = vset.pattern.permute.xlu1 %v3112_v59 }
 0x313   :  { %1893 = vperm.xlu2 %3054, %v4455_v46   ;;  %1886 = vperm.xlu1 %3053, %v4455_v46  }
 0x31b   :  { %3056 = vset.pattern.permute.xlu2 %v3113_v26  ;;  %3055 = vset.pattern.permute.xlu1 %v3114_v60 }
 0x31c   :  { %1907 = vperm.xlu2 %3056, %v4455_v46   ;;  %1900 = vperm.xlu1 %3055, %v4455_v46  }
 0x324   :  { %3059 = vset.pattern.permute.xlu2 %v3115_v61  ;;  %3058 = vset.pattern.permute.xlu1 %v3116_v62 }
 0x325   :  { %1928 = vperm.xlu2 %3059, %v4455_v46   ;;  %1921 = vperm.xlu1 %3058, %v4455_v46  }
 0x32d   :  { %3061 = vset.pattern.permute.xlu2 %v3117_v4  ;;  %3060 = vset.pattern.permute.xlu1 %v3118_v63 }
 0x32e   :  { %1942 = vperm.xlu2 %3061, %v4455_v46   ;;  %1935 = vperm.xlu1 %3060, %v4455_v46  }
 0x335   :  { %v1803_v7 = vpop.permute.xlu2 %1802 }
 0x336   :  { %3064 = vset.pattern.permute.xlu2 %v3119_v0  ;;  %3063 = vset.pattern.permute.xlu1 %v3120_v1  ;;  %vm1805_vm12 = vcmp.gt.f32.partialorder %v1803_v7, %v4455_v46 }
 0x337   :  { %1963 = vperm.xlu2 %3064, %v4455_v46   ;;  %1956 = vperm.xlu1 %3063, %v4455_v46   ;;  %v1806_v19 = vsel %vm1805_vm12, 1.0, %v3096_v38 }
 0x33e   :  { %v1817_v9 = vpop.permute.xlu2 %1816 }
 0x33f   :  { %3066 = vset.pattern.permute.xlu2 %v3121_v2  ;;  %3065 = vset.pattern.permute.xlu1 %v3122_v3  ;;  %vm1819_vm14 = vcmp.gt.f32.partialorder %v1817_v9, %v4455_v46 }
 0x340   :  { %1977 = vperm.xlu2 %3066, %v4455_v46   ;;  %1970 = vperm.xlu1 %3065, %v4455_v46   ;;  %v1820_v28 = vsel %vm1819_vm14, 1.0, %v3096_v38 }
 0x348   :  { %3069 = vset.pattern.permute.xlu2 %v3123_v6  ;;  %3068 = vset.pattern.permute.xlu1 %v3124_v20  ;;  %v1831_v16 = vpop.permute.xlu2 %1830 }
 0x349   :  { %1998 = vperm.xlu2 %3069, %v4455_v46   ;;  %1991 = vperm.xlu1 %3068, %v4455_v46   ;;  %vm1833_vm0 = vcmp.gt.f32.partialorder %v1831_v16, %v4455_v46 }
 0x34a   :  { %v1834_v31 = vsel %vm1833_vm0, 1.0, %v3096_v38 }
 0x34d   :  { %v1796_v5 = vpop.permute.xlu1 %1795 }
 0x34e   :  { %vm1798_vm11 = vcmp.gt.f32.partialorder %v1796_v5, %v4455_v46  ;;  %v1838_v41 = vpop.permute.xlu0 %1837 }
 0x34f   :  { %v1799_v18 = vsel %vm1798_vm11, 1.0, %v3096_v38  ;;  %vm1840_vm1 = vcmp.gt.f32.partialorder %v1838_v41, %v4455_v46 }
 0x350   :  { %v1807_v24 = vadd.f32 %v1806_v19, %v1799_v18  ;;  %v1841_v34 = vsel %vm1840_vm1, 1.0, %v3096_v38 }
 0x351   :  { %3070 = vset.pattern.permute.xlu1 %v3125_v21  ;;  %v1852_v14 = vpop.permute.xlu2 %1851 }
 0x352   :  { %2005 = vperm.xlu1 %3070, %v4455_v46   ;;  %vm1854_vm3 = vcmp.gt.f32.partialorder %v1852_v14, %v4455_v46 }
 0x353   :  { %v1855_v15 = vsel %vm1854_vm3, 1.0, %v3096_v38 }
 0x357   :  { %v1810_v8 = vpop.permute.xlu1 %1809  ;;  %v1915_v0 = vpop.permute.xlu0 %1914 }
 0x358   :  { %vm1812_vm13 = vcmp.gt.f32.partialorder %v1810_v8, %v4455_v46 }
 0x359   :  { %v1813_v22 = vsel %vm1812_vm13, 1.0, %v3096_v38  ;;  %vm1917_vm13 = vcmp.gt.f32.partialorder %v1915_v0, %v4455_v46 }
 0x35a   :  { %v1814_v27 = vadd.f32 %v1813_v22, %v1807_v24  ;;  %v1918_v3 = vsel %vm1917_vm13, 1.0, %v3096_v38  ;;  %vm2024_vm13 = vcmp.gt.f32.partialorder %v4446_v33, 0.0 }
 0x35b   :  { %v1866_v25 = vpop.permute.xlu2 %1865 }
 0x35c   :  { %v1821_v30 = vadd.f32 %v1820_v28, %v1814_v27  ;;  %vm1868_vm5 = vcmp.gt.f32.partialorder %v1866_v25, %v4455_v46 }
 0x35d   :  { %v1869_v49 = vsel %vm1868_vm5, 1.0, %v3096_v38 }
 0x360   :  { %v1824_v10 = vpop.permute.xlu1 %1823 }
 0x361   :  { %vm1826_vm15 = vcmp.gt.f32.partialorder %v1824_v10, %v4455_v46  ;;  %v1950_v16 = vpop.permute.xlu0 %1949 }
 0x362   :  { %v1827_v29 = vsel %vm1826_vm15, 1.0, %v3096_v38 }
 0x363   :  { %v1828_v12 = vadd.f32 %v1827_v29, %v1821_v30 }
 0x364   :  { %v1880_v44 = vpop.permute.xlu2 %1879 }
 0x365   :  { %v1835_v42 = vadd.f32 %v1834_v31, %v1828_v12  ;;  %vm1882_vm7 = vcmp.gt.f32.partialorder %v1880_v44, %v4455_v46 }
 0x366   :  { %v1883_v56 = vsel %vm1882_vm7, 1.0, %v3096_v38 }
 0x367   :  { %v1842_v36 = vadd.f32 %v1841_v34, %v1835_v42 }
 0x36a   :  { %v1845_v13 = vpop.permute.xlu1 %1844  ;;  %v1985_v41 = vpop.permute.xlu0 %1984 }
 0x36b   :  { %vm1847_vm2 = vcmp.gt.f32.partialorder %v1845_v13, %v4455_v46  ;;  %vm1987_vm7 = vcmp.gt.f32.partialorder %v1985_v41, %v4455_v46 }
 0x36c   :  { %v1848_v35 = vsel %vm1847_vm2, 1.0, %v3096_v38  ;;  %vm1952_vm2 = vcmp.gt.f32.partialorder %v1950_v16, %v4455_v46 }
 0x36d   :  { %v1849_v37 = vadd.f32 %v1848_v35, %v1842_v36  ;;  %v1894_v39 = vpop.permute.xlu2 %1893  ;;  %v1953_v19 = vsel %vm1952_vm2, 1.0, %v3096_v38 }
 0x36e   :  { %vm1896_vm9 = vcmp.gt.f32.partialorder %v1894_v39, %v4455_v46 }
 0x36f   :  { %v1856_v43 = vadd.f32 %v1855_v15, %v1849_v37  ;;  %v1897_v26 = vsel %vm1896_vm9, 1.0, %v3096_v38 }
 0x372   :  { %2020 = vadd.xlane.f32.xlu2 %v2019_v11 }
 0x373   :  { %v1859_v17 = vpop.permute.xlu1 %1858 }
 0x374   :  { %vm1861_vm4 = vcmp.gt.f32.partialorder %v1859_v17, %v4455_v46  ;;  %v2013_v15 = vpop.permute.xlu0 %2012 }
 0x375   :  { %v1862_v47 = vsel %vm1861_vm4, 1.0, %v3096_v38 }
 0x376   :  { %v1863_v48 = vadd.f32 %v1862_v47, %v1856_v43  ;;  %v1908_v54 = vpop.permute.xlu2 %1907 }
 0x377   :  { %vm1910_vm12 = vcmp.gt.f32.partialorder %v1908_v54, %v4455_v46 }
 0x378   :  { %v1870_v52 = vadd.f32 %v1869_v49, %v1863_v48  ;;  %v1911_v1 = vsel %vm1910_vm12, 1.0, %v3096_v38  ;;  %vm2015_vm12 = vcmp.gt.f32.partialorder %v2013_v15, %v4455_v46 }
 0x37c   :  { %v1873_v51 = vpop.permute.xlu1 %1872 }
 0x37d   :  { %vm1875_vm6 = vcmp.gt.f32.partialorder %v1873_v51, %v4455_v46 }
 0x37e   :  { %v1876_v50 = vsel %vm1875_vm6, 1.0, %v3096_v38 }
 0x37f   :  { %v1877_v53 = vadd.f32 %v1876_v50, %v1870_v52  ;;  %v1929_v62 = vpop.permute.xlu2 %1928  ;;  %v2016_v50 = vsel %vm2015_vm12, 1.0, %v3096_v38 }
 0x380   :  { %vm1931_vm15 = vcmp.gt.f32.partialorder %v1929_v62, %v4455_v46 }
 0x381   :  { %v1884_v58 = vadd.f32 %v1883_v56, %v1877_v53  ;;  %v1932_v8 = vsel %vm1931_vm15, 1.0, %v3096_v38 }
 0x385   :  { %v1887_v32 = vpop.permute.xlu1 %1886 }
 0x386   :  { %vm1889_vm8 = vcmp.gt.f32.partialorder %v1887_v32, %v4455_v46  ;;  %v1988_v32 = vsel %vm1987_vm7, 1.0, %v3096_v38 }
 0x387   :  { %v1890_v57 = vsel %vm1889_vm8, 1.0, %v3096_v38 }
 0x388   :  { %v1891_v59 = vadd.f32 %v1890_v57, %v1884_v58  ;;  %v1943_v21 = vpop.permute.xlu2 %1942  ;;  %v2032_v57 = vlaneseq }
 0x389   :  { %vm1945_vm1 = vcmp.gt.f32.partialorder %v1943_v21, %v4455_v46 }
 0x38a   :  { %v1898_v61 = vadd.f32 %v1897_v26, %v1891_v59  ;;  %v1946_v13 = vsel %vm1945_vm1, 1.0, %v3096_v38 }
 0x38e   :  { %v1901_v40 = vpop.permute.xlu1 %1900 }
 0x38f   :  { %vm1903_vm11 = vcmp.gt.f32.partialorder %v1901_v40, %v4455_v46 }
 0x390   :  { %v1904_v60 = vsel %vm1903_vm11, 1.0, %v3096_v38 }
 0x391   :  { %v1905_v63 = vadd.f32 %v1904_v60, %v1898_v61  ;;  %v1964_v14 = vpop.permute.xlu2 %1963 }
 0x392   :  { %vm1966_vm4 = vcmp.gt.f32.partialorder %v1964_v14, %v4455_v46 }
 0x393   :  { %v1912_v2 = vadd.f32 %v1911_v1, %v1905_v63  ;;  %v1967_v51 = vsel %vm1966_vm4, 1.0, %v3096_v38 }
 0x395   :  { %v1919_v20 = vadd.f32 %v1918_v3, %v1912_v2 }
 0x397   :  { %v1922_v55 = vpop.permute.xlu1 %1921 }
 0x398   :  { %vm1924_vm14 = vcmp.gt.f32.partialorder %v1922_v55, %v4455_v46 }
 0x399   :  { %v1925_v6 = vsel %vm1924_vm14, 1.0, %v3096_v38 }
 0x39a   :  { %v1926_v7 = vadd.f32 %v1925_v6, %v1919_v20  ;;  %v1978_v27 = vpop.permute.xlu2 %1977 }
 0x39b   :  { %vm1980_vm6 = vcmp.gt.f32.partialorder %v1978_v27, %v4455_v46 }
 0x39c   :  { %v1933_v10 = vadd.f32 %v1932_v8, %v1926_v7  ;;  %v1981_v31 = vsel %vm1980_vm6, 1.0, %v3096_v38 }
 0x3a0   :  { %v1936_v4 = vpop.permute.xlu1 %1935 }
 0x3a1   :  { %vm1938_vm0 = vcmp.gt.f32.partialorder %v1936_v4, %v4455_v46 }
 0x3a2   :  { %v1939_v9 = vsel %vm1938_vm0, 1.0, %v3096_v38 }
 0x3a3   :  { %v1940_v11 = vadd.f32 %v1939_v9, %v1933_v10  ;;  %v1999_v42 = vpop.permute.xlu2 %1998 }
 0x3a4   :  { %vm2001_vm9 = vcmp.gt.f32.partialorder %v1999_v42, %v4455_v46 }
 0x3a5   :  { %v1947_v18 = vadd.f32 %v1946_v13, %v1940_v11  ;;  %v2002_v39 = vsel %vm2001_vm9, 1.0, %v3096_v38 }
 0x3a7   :  { %v1954_v24 = vadd.f32 %v1953_v19, %v1947_v18 }
 0x3a9   :  { %v1957_v5 = vpop.permute.xlu1 %1956 }
 0x3aa   :  { %vm1959_vm3 = vcmp.gt.f32.partialorder %v1957_v5, %v4455_v46 }
 0x3ab   :  { %v1960_v22 = vsel %vm1959_vm3, 1.0, %v3096_v38 }
 0x3ac   :  { %v1961_v25 = vadd.f32 %v1960_v22, %v1954_v24 }
 0x3ae   :  { %v1968_v30 = vadd.f32 %v1967_v51, %v1961_v25 }
 0x3b2   :  { %v1971_v17 = vpop.permute.xlu1 %1970 }
 0x3b3   :  { %vm1973_vm5 = vcmp.gt.f32.partialorder %v1971_v17, %v4455_v46 }
 0x3b4   :  { %v1974_v28 = vsel %vm1973_vm5, 1.0, %v3096_v38 }
 0x3b5   :  { %v1975_v12 = vadd.f32 %v1974_v28, %v1968_v30 }
 0x3b7   :  { %v1982_v44 = vadd.f32 %v1981_v31, %v1975_v12 }
 0x3b9   :  { %v1989_v36 = vadd.f32 %v1988_v32, %v1982_v44 }
 0x3bb   :  { %v1992_v29 = vpop.permute.xlu1 %1991 }
 0x3bc   :  { %vm1994_vm8 = vcmp.gt.f32.partialorder %v1992_v29, %v4455_v46 }
 0x3bd   :  { %v1995_v34 = vsel %vm1994_vm8, 1.0, %v3096_v38 }
 0x3be   :  { %v1996_v37 = vadd.f32 %v1995_v34, %v1989_v36 }
 0x3c0   :  { %v2003_v40 = vadd.f32 %v2002_v39, %v1996_v37 }
 0x3c4   :  { %v2006_v35 = vpop.permute.xlu1 %2005 }
 0x3c5   :  { %vm2008_vm11 = vcmp.gt.f32.partialorder %v2006_v35, %v4455_v46  ;;  %v2033_v46 = vand.u32 127, %v2032_v57 }
 0x3c6   :  { %v2009_v47 = vsel %vm2008_vm11, 1.0, %v3096_v38 }
 0x3c7   :  { %v2010_v43 = vadd.f32 %v2009_v47, %v2003_v40  ;;  %vm2035_vm0 = vcmp.eq.s32.totalorder %v2033_v46, 1  ;;  %vm2034_vm1 = vcmp.eq.s32.totalorder %v2033_v46, 0 }
 0x3c9   :  { %v2017_v52 = vadd.f32 %v2016_v50, %v2010_v43 }
 0x3e5   :  { %v2021_v48 = vpop.xlane.xlu2 %2020 }
 0x3e6   :  { %v2022_v49 = vmul.f32 3.0, %v2021_v48 }
 0x3e8   :  { %v2023_v53 = vmin.f32 %v2022_v49, 31.0 }
 0x3ea   :  { %vm2025_vm14 = vcmp.lt.f32.partialorder %v2017_v52, %v2023_v53 }
 0x3eb   :  { %vm2026_vm15 = vmor %vm2024_vm13, %vm2025_vm14 }
 0x3ec   :  { %v2027_v54 = vsel %vm2026_vm15, 1.0, %v3096_v38 }
 0x3ed   :  { %v2028_v55 = vmul.f32 %v2027_v54, %v4452_v45 }
 0x3ef   :  { %v2029_v56 = vsel %vm2018_vm10, %v2028_v55, 0.0 }
 0x3f0   :  { %2030 = vadd.xlane.f32.xlu1 %v2029_v56 }
 0x463   :  { %v2031_v58 = vpop.xlane.xlu1 %2030 }
 0x464   :  { %v2036_v59 = vsel %vm2035_vm0, %v2031_v58, 0.0 }
 0x465   :  { %v2037_v26 = vsel %vm2034_vm1, %v4497_v23, %v2036_v59 }
 0x466   :  { %2038 = vst [vmem:[%s4571_s6] sm:$0xff] %v2037_v26 }

</bundles_post_ra>
